<compile_context>
chip_gen: v7x
topology: tpu7x:2x2x1
jax: 0.10.0
libtpu: 0.0.40
codegen_flags: <defaults>
</compile_context>

<pallas_src>
import functools
from typing import NamedTuple

import jax
import jax.numpy as jnp
from jax.experimental import pallas as pl
from jax.experimental.pallas import tpu as pltpu


def _conv_out(size, k, s):
    return (size - k) // s + 1


class Geom(NamedTuple):
    """Static geometry (hashable -> usable as a jit static arg)."""
    c_in: int
    h: int
    w: int
    oh1: int
    ow1: int
    c1: int
    kh2: int
    kw2: int
    s2: int
    oh2: int
    ow2: int
    c2: int
    kh3: int
    kw3: int
    s3: int
    oh3: int
    ow3: int
    c3: int
    n_actions: int
    n_act_pad: int


# -----------------------------------------------------------------------------
# Fused kernel: conv1 GEMM + conv2 GEMM + conv3 GEMM + fc1 + fc2 (+ReLUs).
# One grid step = one batch tile of `bt` frames.  All slice offsets below are
# static Python ints, so everything unrolls at trace time into plain static
# slices, concats and five 2-D matmuls.
# -----------------------------------------------------------------------------
def _dqn_fused_kernel(p1_ref, w1_ref, b1_ref, w2_ref, b2_ref, w3_ref, b3_ref,
                      wf1_ref, bf1_ref, wf2_ref, bf2_ref, o_ref, *,
                      bt, s2, oh1, ow1, kh2, kw2, oh2, ow2,
                      kh3, kw3, oh3, ow3):
    f32, bf16 = jnp.float32, jnp.bfloat16

    # ---- conv1: uint8 im2col patches (parity-blocked row order) -> one GEMM.
    #      /256 is folded into w1 at pack time; uint8 values are exact in bf16.
    x1 = p1_ref[0].astype(f32).astype(bf16)            # (oh1*ow1*bt, 64*c_in)
    a1 = jnp.dot(x1, w1_ref[...], preferred_element_type=f32) + b1_ref[...]
    a1 = jnp.maximum(a1, 0.0)                          # rows: (yp, xp, yh, xh, b)

    # Static parity-block bookkeeping (matches the XLA-side patch builder).
    ny = [(oh1 - p + s2 - 1) // s2 for p in range(s2)]
    nx = [(ow1 - p + s2 - 1) // s2 for p in range(s2)]
    blk_off = {}
    off = 0
    for yp in range(s2):
        for xp in range(s2):
            blk_off[(yp, xp)] = off
            off += ny[yp] * nx[xp] * bt

    # ---- conv2: in-VMEM im2col -> ONE (oh2*ow2*bt, kh2*kw2*c1) GEMM.
    #      Thanks to the parity-blocked a1 row order, each (tap, output-row)
    #      gather is a contiguous, unit-stride leading-dim slice.
    taps = []
    for i in range(kh2):
        ip, ih = i % s2, i // s2
        for j in range(kw2):
            jp, jh = j % s2, j // s2
            rows = []
            for oy in range(oh2):
                st = blk_off[(ip, jp)] + ((oy + ih) * nx[jp] + jh) * bt
                rows.append(a1[st:st + ow2 * bt, :])   # (ow2*bt, c1)
            taps.append(rows[0] if len(rows) == 1
                        else jnp.concatenate(rows, axis=0))
    p2 = taps[0] if len(taps) == 1 else jnp.concatenate(taps, axis=-1)
    a2 = jnp.dot(p2.astype(bf16), w2_ref[...],
                 preferred_element_type=f32) + b2_ref[...]
    a2 = jnp.maximum(a2, 0.0)                          # rows: (y2, x2, b)

    # ---- conv3 (stride 1): same im2col trick, ONE (oh3*ow3*bt, 576) GEMM.
    taps = []
    for i in range(kh3):
        for j in range(kw3):
            rows = []
            for oy in range(oh3):
                st = ((oy + i) * ow2 + j) * bt
                rows.append(a2[st:st + ow3 * bt, :])   # (ow3*bt, c2)
            taps.append(rows[0] if len(rows) == 1
                        else jnp.concatenate(rows, axis=0))
    p3 = taps[0] if len(taps) == 1 else jnp.concatenate(taps, axis=-1)
    a3 = jnp.dot(p3.astype(bf16), w3_ref[...],
                 preferred_element_type=f32) + b3_ref[...]
    a3 = jnp.maximum(a3, 0.0)                          # rows: (y3, x3, b)

    # ---- fc1: ONE (bt, oh3*ow3*c3) GEMM.  wf1 was packed in (y, x, c) order,
    #      which reproduces PyTorch's NCHW .view(N, -1) flatten exactly.
    blocks = [a3[p * bt:(p + 1) * bt, :] for p in range(oh3 * ow3)]
    f_in = blocks[0] if len(blocks) == 1 else jnp.concatenate(blocks, axis=-1)
    f1 = jnp.dot(f_in.astype(bf16), wf1_ref[...],
                 preferred_element_type=f32) + bf1_ref[...]
    f1 = jnp.maximum(f1, 0.0)                          # (bt, 512)

    # ---- fc2 (lane-padded to 128 output columns -> lane-dense store).
    o_ref[0] = jnp.dot(f1.astype(bf16), wf2_ref[...],
                       preferred_element_type=f32) + bf2_ref[...]


# -----------------------------------------------------------------------------
# Layout-only glue (runs in XLA, stays uint8): conv1 im2col with rows emitted
# in parity-blocked order (yp, xp, yh, xh, b-within-tile), per batch tile, so
# the kernel's conv2 gathers are contiguous.
# -----------------------------------------------------------------------------
def _conv1_patches_parity(x_nhwc, kh, kw, stride, s2, batch_tile):
    n, h, w, c = x_nhwc.shape
    oh = _conv_out(h, kh, stride)
    ow = _conv_out(w, kw, stride)
    k1 = kh * kw * c
    cols = []
    for i in range(kh):
        for j in range(kw):
            cols.append(x_nhwc[:, i:i + stride * oh:stride,
                               j:j + stride * ow:stride, :])
    patches = jnp.stack(cols, axis=3).reshape(n, oh, ow, k1)     # uint8
    n_tiles = n // batch_tile
    patches = patches.reshape(n_tiles, batch_tile, oh, ow, k1)
    blocks = []
    for yp in range(s2):
        for xp in range(s2):
            blk = patches[:, :, yp::s2, xp::s2, :]        # (nt, bt, nyh, nxh, k1)
            blk = jnp.transpose(blk, (0, 2, 3, 1, 4))     # (nt, nyh, nxh, bt, k1)
            blocks.append(blk.reshape(n_tiles, -1, k1))
    return jnp.concatenate(blocks, axis=1)                # (nt, oh*ow*bt, k1)


# -----------------------------------------------------------------------------
# Parameters: PyTorch-layout init + one-time packing into kernel layout.
# -----------------------------------------------------------------------------
def init_dqn_params(key, input_shape, n_actions):
    """Parameters in PyTorch layout (Conv2d: (O, I, KH, KW); Linear: (out, in))."""
    c_in, h, w = input_shape
    ks = jax.random.split(key, 10)

    def w_init(k, shape, fan_in):
        return jax.random.normal(k, shape, dtype=jnp.float32) / jnp.sqrt(
            jnp.float32(fan_in))

    oh1, ow1 = _conv_out(h, 8, 4), _conv_out(w, 8, 4)
    oh2, ow2 = _conv_out(oh1, 4, 2), _conv_out(ow1, 4, 2)
    oh3, ow3 = _conv_out(oh2, 3, 1), _conv_out(ow2, 3, 1)
    conv_out_size = 64 * oh3 * ow3
    return {
        "conv1_w": w_init(ks[0], (32, c_in, 8, 8), c_in * 64),
        "conv1_b": w_init(ks[1], (32,), 32),
        "conv2_w": w_init(ks[2], (64, 32, 4, 4), 32 * 16),
        "conv2_b": w_init(ks[3], (64,), 64),
        "conv3_w": w_init(ks[4], (64, 64, 3, 3), 64 * 9),
        "conv3_b": w_init(ks[5], (64,), 64),
        "fc1_w": w_init(ks[6], (512, conv_out_size), conv_out_size),
        "fc1_b": w_init(ks[7], (512,), 512),
        "fc2_w": w_init(ks[8], (n_actions, 512), 512),
        "fc2_b": w_init(ks[9], (n_actions,), 512),
    }


def pack_params(params, input_shape, n_actions):
    """One-time re-layout: dense bf16 GEMM slabs for the fused kernel."""
    c_in, h, w = input_shape
    oh1, ow1 = _conv_out(h, 8, 4), _conv_out(w, 8, 4)
    oh2, ow2 = _conv_out(oh1, 4, 2), _conv_out(ow1, 4, 2)
    oh3, ow3 = _conv_out(oh2, 3, 1), _conv_out(ow2, 3, 1)
    n_act_pad = ((n_actions + 127) // 128) * 128
    bf16 = jnp.bfloat16

    # conv1: (KH*KW*Cin, 32), feature order (ky, kx, c); x/256 folded in (exact).
    w1 = jnp.transpose(params["conv1_w"], (2, 3, 1, 0)).reshape(8 * 8 * c_in, 32)
    w1 = (w1 * (1.0 / 256.0)).astype(bf16)
    # conv2 / conv3: flattened (KH*KW*Cin, Cout) im2col GEMM slabs.
    w2 = jnp.transpose(params["conv2_w"], (2, 3, 1, 0)).reshape(4 * 4 * 32, 64).astype(bf16)
    w3 = jnp.transpose(params["conv3_w"], (2, 3, 1, 0)).reshape(3 * 3 * 64, 64).astype(bf16)
    # fc1: (oh3*ow3*64, 512) in (y, x, c) order == PyTorch NCHW .view(N, -1).
    wf1 = params["fc1_w"].reshape(512, 64, oh3, ow3)
    wf1 = jnp.transpose(wf1, (2, 3, 1, 0)).reshape(oh3 * ow3 * 64, 512).astype(bf16)
    # fc2: transposed + lane-padded so the kernel's output store is lane-dense.
    wf2 = jnp.pad(jnp.transpose(params["fc2_w"]),
                  ((0, 0), (0, n_act_pad - n_actions))).astype(bf16)
    bf2 = jnp.pad(params["fc2_b"], (0, n_act_pad - n_actions))

    geom = Geom(c_in=c_in, h=h, w=w, oh1=oh1, ow1=ow1, c1=32,
                kh2=4, kw2=4, s2=2, oh2=oh2, ow2=ow2, c2=64,
                kh3=3, kw3=3, s3=1, oh3=oh3, ow3=ow3, c3=64,
                n_actions=n_actions, n_act_pad=n_act_pad)
    return {
        "geom": geom,
        "w1": w1, "b1": params["conv1_b"].reshape(1, 32),
        "w2": w2, "b2": params["conv2_b"].reshape(1, 64),
        "w3": w3, "b3": params["conv3_b"].reshape(1, 64),
        "wf1": wf1, "bf1": params["fc1_b"].reshape(1, 512),
        "wf2": wf2, "bf2": bf2.reshape(1, n_act_pad),
    }


# -----------------------------------------------------------------------------
# Forward pass: one pallas_call with a "parallel" grid over batch tiles.
# -----------------------------------------------------------------------------
@functools.partial(jax.jit, static_argnums=(1, 2))
def _dqn_forward_impl(x_nchw, geom, batch_tile, w1, b1, w2, b2, w3, b3,
                      wf1, bf1, wf2, bf2):
    g = geom
    batch = x_nchw.shape[0]
    n_tiles = batch // batch_tile

    # NCHW -> NHWC (stays uint8); parity-ordered im2col is layout-only XLA work.
    x = jnp.transpose(x_nchw, (0, 2, 3, 1))
    p1 = _conv1_patches_parity(x, 8, 8, 4, g.s2, batch_tile)

    rows1 = g.oh1 * g.ow1 * batch_tile
    k1 = 8 * 8 * g.c_in

    kernel = functools.partial(
        _dqn_fused_kernel, bt=batch_tile, s2=g.s2, oh1=g.oh1, ow1=g.ow1,
        kh2=g.kh2, kw2=g.kw2, oh2=g.oh2, ow2=g.ow2,
        kh3=g.kh3, kw3=g.kw3, oh3=g.oh3, ow3=g.ow3)

    def full2(a):  # whole (2-D) array resident in VMEM, same block every step
        return pl.BlockSpec(a.shape, lambda t: (0, 0))

    in_specs = [pl.BlockSpec((1, rows1, k1), lambda t: (t, 0, 0)),
                full2(w1), full2(b1), full2(w2), full2(b2), full2(w3),
                full2(b3), full2(wf1), full2(bf1), full2(wf2), full2(bf2)]
    out_spec = pl.BlockSpec((1, batch_tile, g.n_act_pad), lambda t: (t, 0, 0))

    # Advisory cost estimate for XLA's scheduler.
    m2 = g.oh2 * g.ow2 * batch_tile
    m3 = g.oh3 * g.ow3 * batch_tile
    flops_tile = 2 * (rows1 * k1 * g.c1
                      + m2 * (g.kh2 * g.kw2 * g.c1) * g.c2
                      + m3 * (g.kh3 * g.kw3 * g.c2) * g.c3
                      + batch_tile * (g.oh3 * g.ow3 * g.c3) * 512
                      + batch_tile * 512 * g.n_act_pad)
    weight_bytes = sum(a.size * a.dtype.itemsize
                       for a in (w1, b1, w2, b2, w3, b3, wf1, bf1, wf2, bf2))
    bytes_accessed = (n_tiles * rows1 * k1            # uint8 patches
                      + n_tiles * batch_tile * g.n_act_pad * 4
                      + weight_bytes)

    q = pl.pallas_call(
        kernel,
        out_shape=jax.ShapeDtypeStruct((n_tiles, batch_tile, g.n_act_pad),
                                       jnp.float32),
        grid=(n_tiles,),
        in_specs=in_specs,
        out_specs=out_spec,
        compiler_params=pltpu.CompilerParams(
            dimension_semantics=("parallel",),
            vmem_limit_bytes=32 * 1024 * 1024),
        cost_estimate=pl.CostEstimate(flops=flops_tile * n_tiles,
                                      transcendentals=0,
                                      bytes_accessed=bytes_accessed),
    )(p1, w1, b1, w2, b2, w3, b3, wf1, bf1, wf2, bf2)

    return q.reshape(batch, g.n_act_pad)[:, :g.n_actions]


def dqn_forward(packed, x_nchw, batch_tile=None):
    """x_nchw: (N, C, H, W) uint8 frames -> (N, n_actions) f32 Q-values."""
    g = packed["geom"]
    batch = x_nchw.shape[0]
    if batch_tile is None:
        # Target >=256 conv1 rows per grid step (MXU-friendly), capped by batch.
        batch_tile = max(1, min(batch, max(1, 256 // (g.oh1 * g.ow1))))
    bt = min(batch_tile, batch)
    while batch % bt:   # keep it a divisor of batch
        bt -= 1
    return _dqn_forward_impl(
        x_nchw, g, bt, packed["w1"], packed["b1"], packed["w2"], packed["b2"],
        packed["w3"], packed["b3"], packed["wf1"], packed["bf1"],
        packed["wf2"], packed["bf2"])


# -----------------------------------------------------------------------------
# Pure-JAX (XLA) reference mirroring the PyTorch module, for validation.
# -----------------------------------------------------------------------------
def dqn_reference(params, x_nchw):
    x = x_nchw.astype(jnp.float32) / 256.0

    def conv(x, w, b, stride):
        y = jax.lax.conv_general_dilated(
            x, w, window_strides=(stride, stride), padding="VALID",
            dimension_numbers=("NCHW", "OIHW", "NCHW"))
        return jax.nn.relu(y + b.reshape(1, -1, 1, 1))

    x = conv(x, params["conv1_w"], params["conv1_b"], 4)
    x = conv(x, params["conv2_w"], params["conv2_b"], 2)
    x = conv(x, params["conv3_w"], params["conv3_b"], 1)
    x = x.reshape(x.shape[0], -1)
    x = jax.nn.relu(x @ params["fc1_w"].T + params["fc1_b"])
    return x @ params["fc2_w"].T + params["fc2_b"]


if __name__ == "__main__":
    # Small shapes consistent with the module: 4 stacked frames, 36x36 spatial
    # (smallest size the conv stack accepts: 36 -> 8 -> 3 -> 1).  batch=4 with
    # batch_tile=2 exercises a real 2-step "parallel" grid.
    batch, channels, spatial, n_actions = 4, 4, 36, 6
    key = jax.random.PRNGKey(0)
    k_params, k_x = jax.random.split(key)

    params = init_dqn_params(k_params, (channels, spatial, spatial), n_actions)
    packed = pack_params(params, (channels, spatial, spatial), n_actions)

    x = jax.random.randint(k_x, (batch, channels, spatial, spatial), 0, 256,
                           dtype=jnp.int32).astype(jnp.uint8)

    q = dqn_forward(packed, x, batch_tile=2)
    jax.block_until_ready(q)

    assert q.shape == (batch, n_actions), q.shape
    assert q.dtype == jnp.float32, q.dtype
    assert bool(jnp.all(jnp.isfinite(q))), "non-finite Q-values"

    q_ref = dqn_reference(params, x)
    max_err = float(jnp.max(jnp.abs(q - q_ref)))
    assert max_err < 5e-2, f"mismatch vs XLA reference: max|diff|={max_err}"

    print("KERNEL_OK")
</pallas_src>

<mosaic_0001>
module attributes {stable_mosaic.version = 11 : i64} {
  func.func @_dqn_fused_kernel(%arg0: i32, %arg1: memref<1x128x256xi8, #tpu.memory_space<vmem>>, %arg2: memref<256x32xbf16, #tpu.memory_space<vmem>>, %arg3: memref<1x32xf32, #tpu.memory_space<vmem>>, %arg4: memref<512x64xbf16, #tpu.memory_space<vmem>>, %arg5: memref<1x64xf32, #tpu.memory_space<vmem>>, %arg6: memref<576x64xbf16, #tpu.memory_space<vmem>>, %arg7: memref<1x64xf32, #tpu.memory_space<vmem>>, %arg8: memref<64x512xbf16, #tpu.memory_space<vmem>>, %arg9: memref<1x512xf32, #tpu.memory_space<vmem>>, %arg10: memref<512x128xbf16, #tpu.memory_space<vmem>>, %arg11: memref<1x128xf32, #tpu.memory_space<vmem>>, %arg12: memref<1x2x128xf32, #tpu.memory_space<vmem>>) attributes {dimension_semantics = [#tpu.dimension_semantics<parallel>], iteration_bounds = array<i64: 2>, scalar_prefetch = 0 : i64, scratch_operands = 0 : i64, tpu.core_type = #tpu.core_type<tc>, window_params = [{transform_indices = @transform_0, window_bounds = array<i64: 1, 128, 256>}, {pipeline_mode = #tpu.pipeline_mode<synchronous>, transform_indices = @transform_1, window_bounds = array<i64: 256, 32>}, {pipeline_mode = #tpu.pipeline_mode<synchronous>, transform_indices = @transform_2, window_bounds = array<i64: 1, 32>}, {pipeline_mode = #tpu.pipeline_mode<synchronous>, transform_indices = @transform_3, window_bounds = array<i64: 512, 64>}, {pipeline_mode = #tpu.pipeline_mode<synchronous>, transform_indices = @transform_4, window_bounds = array<i64: 1, 64>}, {pipeline_mode = #tpu.pipeline_mode<synchronous>, transform_indices = @transform_5, window_bounds = array<i64: 576, 64>}, {pipeline_mode = #tpu.pipeline_mode<synchronous>, transform_indices = @transform_6, window_bounds = array<i64: 1, 64>}, {pipeline_mode = #tpu.pipeline_mode<synchronous>, transform_indices = @transform_7, window_bounds = array<i64: 64, 512>}, {pipeline_mode = #tpu.pipeline_mode<synchronous>, transform_indices = @transform_8, window_bounds = array<i64: 1, 512>}, {pipeline_mode = #tpu.pipeline_mode<synchronous>, transform_indices = @transform_9, window_bounds = array<i64: 512, 128>}, {pipeline_mode = #tpu.pipeline_mode<synchronous>, transform_indices = @transform_10, window_bounds = array<i64: 1, 128>}, {transform_indices = @transform_11, window_bounds = array<i64: 1, 2, 128>}]} {
    %c0 = arith.constant 0 : index
    %c0_0 = arith.constant 0 : index
    %c0_1 = arith.constant 0 : index
    %0 = vector.load %arg1[%c0, %c0_0, %c0_1] : memref<1x128x256xi8, #tpu.memory_space<vmem>>, vector<1x128x256xi8>
    %1 = vector.shape_cast %0 : vector<1x128x256xi8> to vector<128x256xi8>
    %2 = arith.uitofp %1 : vector<128x256xi8> to vector<128x256xf32>
    %3 = arith.truncf %2 : vector<128x256xf32> to vector<128x256xbf16>
    %c0_2 = arith.constant 0 : index
    %c0_3 = arith.constant 0 : index
    %4 = vector.load %arg2[%c0_2, %c0_3] : memref<256x32xbf16, #tpu.memory_space<vmem>>, vector<256x32xbf16>
    %cst = arith.constant dense<0.000000e+00> : vector<128x32xf32>
    %5 = tpu.matmul %3, %4, %cst {dimension_numbers = #tpu.dot_dimension_numbers<[1], [0], [0], [1], [0, 0, 1, 1], [], []>} : vector<128x256xbf16>, vector<256x32xbf16>, vector<128x32xf32> -> vector<128x32xf32>
    %c0_4 = arith.constant 0 : index
    %c0_5 = arith.constant 0 : index
    %6 = vector.load %arg3[%c0_4, %c0_5] : memref<1x32xf32, #tpu.memory_space<vmem>>, vector<1x32xf32>
    %7 = vector.broadcast %6 : vector<1x32xf32> to vector<128x32xf32>
    %8 = arith.addf %5, %7 : vector<128x32xf32>
    %cst_6 = arith.constant 0.000000e+00 : f32
    %9 = vector.broadcast %cst_6 : f32 to vector<128x32xf32>
    %10 = arith.maximumf %8, %9 : vector<128x32xf32>
    %11 = vector.extract_strided_slice %10 {offsets = [0, 0], sizes = [6, 32], strides = [1, 1]} : vector<128x32xf32> to vector<6x32xf32>
    %12 = vector.extract_strided_slice %10 {offsets = [8, 0], sizes = [6, 32], strides = [1, 1]} : vector<128x32xf32> to vector<6x32xf32>
    %13 = vector.extract_strided_slice %10 {offsets = [16, 0], sizes = [6, 32], strides = [1, 1]} : vector<128x32xf32> to vector<6x32xf32>
    %14 = tpu.concatenate %11, %12, %13 in 0 : vector<6x32xf32>, vector<6x32xf32>, vector<6x32xf32> -> vector<18x32xf32>
    %15 = vector.extract_strided_slice %10 {offsets = [32, 0], sizes = [6, 32], strides = [1, 1]} : vector<128x32xf32> to vector<6x32xf32>
    %16 = vector.extract_strided_slice %10 {offsets = [40, 0], sizes = [6, 32], strides = [1, 1]} : vector<128x32xf32> to vector<6x32xf32>
    %17 = vector.extract_strided_slice %10 {offsets = [48, 0], sizes = [6, 32], strides = [1, 1]} : vector<128x32xf32> to vector<6x32xf32>
    %18 = tpu.concatenate %15, %16, %17 in 0 : vector<6x32xf32>, vector<6x32xf32>, vector<6x32xf32> -> vector<18x32xf32>
    %19 = vector.extract_strided_slice %10 {offsets = [2, 0], sizes = [6, 32], strides = [1, 1]} : vector<128x32xf32> to vector<6x32xf32>
    %20 = vector.extract_strided_slice %10 {offsets = [10, 0], sizes = [6, 32], strides = [1, 1]} : vector<128x32xf32> to vector<6x32xf32>
    %21 = vector.extract_strided_slice %10 {offsets = [18, 0], sizes = [6, 32], strides = [1, 1]} : vector<128x32xf32> to vector<6x32xf32>
    %22 = tpu.concatenate %19, %20, %21 in 0 : vector<6x32xf32>, vector<6x32xf32>, vector<6x32xf32> -> vector<18x32xf32>
    %23 = vector.extract_strided_slice %10 {offsets = [34, 0], sizes = [6, 32], strides = [1, 1]} : vector<128x32xf32> to vector<6x32xf32>
    %24 = vector.extract_strided_slice %10 {offsets = [42, 0], sizes = [6, 32], strides = [1, 1]} : vector<128x32xf32> to vector<6x32xf32>
    %25 = vector.extract_strided_slice %10 {offsets = [50, 0], sizes = [6, 32], strides = [1, 1]} : vector<128x32xf32> to vector<6x32xf32>
    %26 = tpu.concatenate %23, %24, %25 in 0 : vector<6x32xf32>, vector<6x32xf32>, vector<6x32xf32> -> vector<18x32xf32>
    %27 = vector.extract_strided_slice %10 {offsets = [64, 0], sizes = [6, 32], strides = [1, 1]} : vector<128x32xf32> to vector<6x32xf32>
    %28 = vector.extract_strided_slice %10 {offsets = [72, 0], sizes = [6, 32], strides = [1, 1]} : vector<128x32xf32> to vector<6x32xf32>
    %29 = vector.extract_strided_slice %10 {offsets = [80, 0], sizes = [6, 32], strides = [1, 1]} : vector<128x32xf32> to vector<6x32xf32>
    %30 = tpu.concatenate %27, %28, %29 in 0 : vector<6x32xf32>, vector<6x32xf32>, vector<6x32xf32> -> vector<18x32xf32>
    %31 = vector.extract_strided_slice %10 {offsets = [96, 0], sizes = [6, 32], strides = [1, 1]} : vector<128x32xf32> to vector<6x32xf32>
    %32 = vector.extract_strided_slice %10 {offsets = [104, 0], sizes = [6, 32], strides = [1, 1]} : vector<128x32xf32> to vector<6x32xf32>
    %33 = vector.extract_strided_slice %10 {offsets = [112, 0], sizes = [6, 32], strides = [1, 1]} : vector<128x32xf32> to vector<6x32xf32>
    %34 = tpu.concatenate %31, %32, %33 in 0 : vector<6x32xf32>, vector<6x32xf32>, vector<6x32xf32> -> vector<18x32xf32>
    %35 = vector.extract_strided_slice %10 {offsets = [66, 0], sizes = [6, 32], strides = [1, 1]} : vector<128x32xf32> to vector<6x32xf32>
    %36 = vector.extract_strided_slice %10 {offsets = [74, 0], sizes = [6, 32], strides = [1, 1]} : vector<128x32xf32> to vector<6x32xf32>
    %37 = vector.extract_strided_slice %10 {offsets = [82, 0], sizes = [6, 32], strides = [1, 1]} : vector<128x32xf32> to vector<6x32xf32>
    %38 = tpu.concatenate %35, %36, %37 in 0 : vector<6x32xf32>, vector<6x32xf32>, vector<6x32xf32> -> vector<18x32xf32>
    %39 = vector.extract_strided_slice %10 {offsets = [98, 0], sizes = [6, 32], strides = [1, 1]} : vector<128x32xf32> to vector<6x32xf32>
    %40 = vector.extract_strided_slice %10 {offsets = [106, 0], sizes = [6, 32], strides = [1, 1]} : vector<128x32xf32> to vector<6x32xf32>
    %41 = vector.extract_strided_slice %10 {offsets = [114, 0], sizes = [6, 32], strides = [1, 1]} : vector<128x32xf32> to vector<6x32xf32>
    %42 = tpu.concatenate %39, %40, %41 in 0 : vector<6x32xf32>, vector<6x32xf32>, vector<6x32xf32> -> vector<18x32xf32>
    %43 = vector.extract_strided_slice %10 {offsets = [8, 0], sizes = [6, 32], strides = [1, 1]} : vector<128x32xf32> to vector<6x32xf32>
    %44 = vector.extract_strided_slice %10 {offsets = [16, 0], sizes = [6, 32], strides = [1, 1]} : vector<128x32xf32> to vector<6x32xf32>
    %45 = vector.extract_strided_slice %10 {offsets = [24, 0], sizes = [6, 32], strides = [1, 1]} : vector<128x32xf32> to vector<6x32xf32>
    %46 = tpu.concatenate %43, %44, %45 in 0 : vector<6x32xf32>, vector<6x32xf32>, vector<6x32xf32> -> vector<18x32xf32>
    %47 = vector.extract_strided_slice %10 {offsets = [40, 0], sizes = [6, 32], strides = [1, 1]} : vector<128x32xf32> to vector<6x32xf32>
    %48 = vector.extract_strided_slice %10 {offsets = [48, 0], sizes = [6, 32], strides = [1, 1]} : vector<128x32xf32> to vector<6x32xf32>
    %49 = vector.extract_strided_slice %10 {offsets = [56, 0], sizes = [6, 32], strides = [1, 1]} : vector<128x32xf32> to vector<6x32xf32>
    %50 = tpu.concatenate %47, %48, %49 in 0 : vector<6x32xf32>, vector<6x32xf32>, vector<6x32xf32> -> vector<18x32xf32>
    %51 = vector.extract_strided_slice %10 {offsets = [10, 0], sizes = [6, 32], strides = [1, 1]} : vector<128x32xf32> to vector<6x32xf32>
    %52 = vector.extract_strided_slice %10 {offsets = [18, 0], sizes = [6, 32], strides = [1, 1]} : vector<128x32xf32> to vector<6x32xf32>
    %53 = vector.extract_strided_slice %10 {offsets = [26, 0], sizes = [6, 32], strides = [1, 1]} : vector<128x32xf32> to vector<6x32xf32>
    %54 = tpu.concatenate %51, %52, %53 in 0 : vector<6x32xf32>, vector<6x32xf32>, vector<6x32xf32> -> vector<18x32xf32>
    %55 = vector.extract_strided_slice %10 {offsets = [42, 0], sizes = [6, 32], strides = [1, 1]} : vector<128x32xf32> to vector<6x32xf32>
    %56 = vector.extract_strided_slice %10 {offsets = [50, 0], sizes = [6, 32], strides = [1, 1]} : vector<128x32xf32> to vector<6x32xf32>
    %57 = vector.extract_strided_slice %10 {offsets = [58, 0], sizes = [6, 32], strides = [1, 1]} : vector<128x32xf32> to vector<6x32xf32>
    %58 = tpu.concatenate %55, %56, %57 in 0 : vector<6x32xf32>, vector<6x32xf32>, vector<6x32xf32> -> vector<18x32xf32>
    %59 = vector.extract_strided_slice %10 {offsets = [72, 0], sizes = [6, 32], strides = [1, 1]} : vector<128x32xf32> to vector<6x32xf32>
    %60 = vector.extract_strided_slice %10 {offsets = [80, 0], sizes = [6, 32], strides = [1, 1]} : vector<128x32xf32> to vector<6x32xf32>
    %61 = vector.extract_strided_slice %10 {offsets = [88, 0], sizes = [6, 32], strides = [1, 1]} : vector<128x32xf32> to vector<6x32xf32>
    %62 = tpu.concatenate %59, %60, %61 in 0 : vector<6x32xf32>, vector<6x32xf32>, vector<6x32xf32> -> vector<18x32xf32>
    %63 = vector.extract_strided_slice %10 {offsets = [104, 0], sizes = [6, 32], strides = [1, 1]} : vector<128x32xf32> to vector<6x32xf32>
    %64 = vector.extract_strided_slice %10 {offsets = [112, 0], sizes = [6, 32], strides = [1, 1]} : vector<128x32xf32> to vector<6x32xf32>
    %65 = vector.extract_strided_slice %10 {offsets = [120, 0], sizes = [6, 32], strides = [1, 1]} : vector<128x32xf32> to vector<6x32xf32>
    %66 = tpu.concatenate %63, %64, %65 in 0 : vector<6x32xf32>, vector<6x32xf32>, vector<6x32xf32> -> vector<18x32xf32>
    %67 = vector.extract_strided_slice %10 {offsets = [74, 0], sizes = [6, 32], strides = [1, 1]} : vector<128x32xf32> to vector<6x32xf32>
    %68 = vector.extract_strided_slice %10 {offsets = [82, 0], sizes = [6, 32], strides = [1, 1]} : vector<128x32xf32> to vector<6x32xf32>
    %69 = vector.extract_strided_slice %10 {offsets = [90, 0], sizes = [6, 32], strides = [1, 1]} : vector<128x32xf32> to vector<6x32xf32>
    %70 = tpu.concatenate %67, %68, %69 in 0 : vector<6x32xf32>, vector<6x32xf32>, vector<6x32xf32> -> vector<18x32xf32>
    %71 = vector.extract_strided_slice %10 {offsets = [106, 0], sizes = [6, 32], strides = [1, 1]} : vector<128x32xf32> to vector<6x32xf32>
    %72 = vector.extract_strided_slice %10 {offsets = [114, 0], sizes = [6, 32], strides = [1, 1]} : vector<128x32xf32> to vector<6x32xf32>
    %73 = vector.extract_strided_slice %10 {offsets = [122, 0], sizes = [6, 32], strides = [1, 1]} : vector<128x32xf32> to vector<6x32xf32>
    %74 = tpu.concatenate %71, %72, %73 in 0 : vector<6x32xf32>, vector<6x32xf32>, vector<6x32xf32> -> vector<18x32xf32>
    %75 = tpu.concatenate %14, %18, %22, %26, %30, %34, %38, %42, %46, %50, %54, %58, %62, %66, %70, %74 in 1 : vector<18x32xf32>, vector<18x32xf32>, vector<18x32xf32>, vector<18x32xf32>, vector<18x32xf32>, vector<18x32xf32>, vector<18x32xf32>, vector<18x32xf32>, vector<18x32xf32>, vector<18x32xf32>, vector<18x32xf32>, vector<18x32xf32>, vector<18x32xf32>, vector<18x32xf32>, vector<18x32xf32>, vector<18x32xf32> -> vector<18x512xf32>
    %76 = arith.truncf %75 : vector<18x512xf32> to vector<18x512xbf16>
    %c0_7 = arith.constant 0 : index
    %c0_8 = arith.constant 0 : index
    %77 = vector.load %arg4[%c0_7, %c0_8] : memref<512x64xbf16, #tpu.memory_space<vmem>>, vector<512x64xbf16>
    %cst_9 = arith.constant dense<0.000000e+00> : vector<18x64xf32>
    %78 = tpu.matmul %76, %77, %cst_9 {dimension_numbers = #tpu.dot_dimension_numbers<[1], [0], [0], [1], [0, 0, 1, 1], [], []>} : vector<18x512xbf16>, vector<512x64xbf16>, vector<18x64xf32> -> vector<18x64xf32>
    %c0_10 = arith.constant 0 : index
    %c0_11 = arith.constant 0 : index
    %79 = vector.load %arg5[%c0_10, %c0_11] : memref<1x64xf32, #tpu.memory_space<vmem>>, vector<1x64xf32>
    %80 = vector.broadcast %79 : vector<1x64xf32> to vector<18x64xf32>
    %81 = arith.addf %78, %80 : vector<18x64xf32>
    %cst_12 = arith.constant 0.000000e+00 : f32
    %82 = vector.broadcast %cst_12 : f32 to vector<18x64xf32>
    %83 = arith.maximumf %81, %82 : vector<18x64xf32>
    %84 = vector.extract_strided_slice %83 {offsets = [0, 0], sizes = [2, 64], strides = [1, 1]} : vector<18x64xf32> to vector<2x64xf32>
    %85 = vector.extract_strided_slice %83 {offsets = [2, 0], sizes = [2, 64], strides = [1, 1]} : vector<18x64xf32> to vector<2x64xf32>
    %86 = vector.extract_strided_slice %83 {offsets = [4, 0], sizes = [2, 64], strides = [1, 1]} : vector<18x64xf32> to vector<2x64xf32>
    %87 = vector.extract_strided_slice %83 {offsets = [6, 0], sizes = [2, 64], strides = [1, 1]} : vector<18x64xf32> to vector<2x64xf32>
    %88 = vector.extract_strided_slice %83 {offsets = [8, 0], sizes = [2, 64], strides = [1, 1]} : vector<18x64xf32> to vector<2x64xf32>
    %89 = vector.extract_strided_slice %83 {offsets = [10, 0], sizes = [2, 64], strides = [1, 1]} : vector<18x64xf32> to vector<2x64xf32>
    %90 = vector.extract_strided_slice %83 {offsets = [12, 0], sizes = [2, 64], strides = [1, 1]} : vector<18x64xf32> to vector<2x64xf32>
    %91 = vector.extract_strided_slice %83 {offsets = [14, 0], sizes = [2, 64], strides = [1, 1]} : vector<18x64xf32> to vector<2x64xf32>
    %92 = vector.extract_strided_slice %83 {offsets = [16, 0], sizes = [2, 64], strides = [1, 1]} : vector<18x64xf32> to vector<2x64xf32>
    %93 = tpu.concatenate %84, %85, %86, %87, %88, %89, %90, %91, %92 in 1 : vector<2x64xf32>, vector<2x64xf32>, vector<2x64xf32>, vector<2x64xf32>, vector<2x64xf32>, vector<2x64xf32>, vector<2x64xf32>, vector<2x64xf32>, vector<2x64xf32> -> vector<2x576xf32>
    %94 = arith.truncf %93 : vector<2x576xf32> to vector<2x576xbf16>
    %c0_13 = arith.constant 0 : index
    %c0_14 = arith.constant 0 : index
    %95 = vector.load %arg6[%c0_13, %c0_14] : memref<576x64xbf16, #tpu.memory_space<vmem>>, vector<576x64xbf16>
    %cst_15 = arith.constant dense<0.000000e+00> : vector<2x64xf32>
    %96 = tpu.matmul %94, %95, %cst_15 {dimension_numbers = #tpu.dot_dimension_numbers<[1], [0], [0], [1], [0, 0, 1, 1], [], []>} : vector<2x576xbf16>, vector<576x64xbf16>, vector<2x64xf32> -> vector<2x64xf32>
    %c0_16 = arith.constant 0 : index
    %c0_17 = arith.constant 0 : index
    %97 = vector.load %arg7[%c0_16, %c0_17] : memref<1x64xf32, #tpu.memory_space<vmem>>, vector<1x64xf32>
    %98 = vector.broadcast %97 : vector<1x64xf32> to vector<2x64xf32>
    %99 = arith.addf %96, %98 : vector<2x64xf32>
    %cst_18 = arith.constant 0.000000e+00 : f32
    %100 = vector.broadcast %cst_18 : f32 to vector<2x64xf32>
    %101 = arith.maximumf %99, %100 : vector<2x64xf32>
    %102 = arith.truncf %101 : vector<2x64xf32> to vector<2x64xbf16>
    %c0_19 = arith.constant 0 : index
    %c0_20 = arith.constant 0 : index
    %103 = vector.load %arg8[%c0_19, %c0_20] : memref<64x512xbf16, #tpu.memory_space<vmem>>, vector<64x512xbf16>
    %cst_21 = arith.constant dense<0.000000e+00> : vector<2x512xf32>
    %104 = tpu.matmul %102, %103, %cst_21 {dimension_numbers = #tpu.dot_dimension_numbers<[1], [0], [0], [1], [0, 0, 1, 1], [], []>} : vector<2x64xbf16>, vector<64x512xbf16>, vector<2x512xf32> -> vector<2x512xf32>
    %c0_22 = arith.constant 0 : index
    %c0_23 = arith.constant 0 : index
    %105 = vector.load %arg9[%c0_22, %c0_23] : memref<1x512xf32, #tpu.memory_space<vmem>>, vector<1x512xf32>
    %106 = vector.broadcast %105 : vector<1x512xf32> to vector<2x512xf32>
    %107 = arith.addf %104, %106 : vector<2x512xf32>
    %cst_24 = arith.constant 0.000000e+00 : f32
    %108 = vector.broadcast %cst_24 : f32 to vector<2x512xf32>
    %109 = arith.maximumf %107, %108 : vector<2x512xf32>
    %110 = arith.truncf %109 : vector<2x512xf32> to vector<2x512xbf16>
    %c0_25 = arith.constant 0 : index
    %c0_26 = arith.constant 0 : index
    %111 = vector.load %arg10[%c0_25, %c0_26] : memref<512x128xbf16, #tpu.memory_space<vmem>>, vector<512x128xbf16>
    %cst_27 = arith.constant dense<0.000000e+00> : vector<2x128xf32>
    %112 = tpu.matmul %110, %111, %cst_27 {dimension_numbers = #tpu.dot_dimension_numbers<[1], [0], [0], [1], [0, 0, 1, 1], [], []>} : vector<2x512xbf16>, vector<512x128xbf16>, vector<2x128xf32> -> vector<2x128xf32>
    %c0_28 = arith.constant 0 : index
    %c0_29 = arith.constant 0 : index
    %113 = vector.load %arg11[%c0_28, %c0_29] : memref<1x128xf32, #tpu.memory_space<vmem>>, vector<1x128xf32>
    %114 = vector.broadcast %113 : vector<1x128xf32> to vector<2x128xf32>
    %115 = arith.addf %112, %114 : vector<2x128xf32>
    %c0_30 = arith.constant 0 : index
    %c0_31 = arith.constant 0 : index
    %c0_32 = arith.constant 0 : index
    %116 = vector.load %arg12[%c0_30, %c0_31, %c0_32] : memref<1x2x128xf32, #tpu.memory_space<vmem>>, vector<1x2x128xf32>
    %117 = vector.shape_cast %116 : vector<1x2x128xf32> to vector<2x128xf32>
    %118 = vector.shape_cast %115 : vector<2x128xf32> to vector<1x2x128xf32>
    tpu.vector_store %arg12[%c0_30, %c0_31, %c0_32], %118 {strides = array<i32>} : memref<1x2x128xf32, #tpu.memory_space<vmem>>, vector<1x2x128xf32>,
    return
  }
  func.func @transform_0(%arg0: i32) -> (i32, i32, i32) {
    %c0_i32 = arith.constant 0 : i32
    %c0_i32_0 = arith.constant 0 : i32
    %c0_i32_1 = arith.constant 0 : i32
    return %arg0, %c0_i32, %c0_i32_0 : i32, i32, i32
  }
  func.func @transform_1(%arg0: i32) -> (i32, i32) {
    %c0_i32 = arith.constant 0 : i32
    %c0_i32_0 = arith.constant 0 : i32
    %c0_i32_1 = arith.constant 0 : i32
    return %c0_i32, %c0_i32_0 : i32, i32
  }
  func.func @transform_2(%arg0: i32) -> (i32, i32) {
    %c0_i32 = arith.constant 0 : i32
    %c0_i32_0 = arith.constant 0 : i32
    %c0_i32_1 = arith.constant 0 : i32
    return %c0_i32, %c0_i32_0 : i32, i32
  }
  func.func @transform_3(%arg0: i32) -> (i32, i32) {
    %c0_i32 = arith.constant 0 : i32
    %c0_i32_0 = arith.constant 0 : i32
    %c0_i32_1 = arith.constant 0 : i32
    return %c0_i32, %c0_i32_0 : i32, i32
  }
  func.func @transform_4(%arg0: i32) -> (i32, i32) {
    %c0_i32 = arith.constant 0 : i32
    %c0_i32_0 = arith.constant 0 : i32
    %c0_i32_1 = arith.constant 0 : i32
    return %c0_i32, %c0_i32_0 : i32, i32
  }
  func.func @transform_5(%arg0: i32) -> (i32, i32) {
    %c0_i32 = arith.constant 0 : i32
    %c0_i32_0 = arith.constant 0 : i32
    %c0_i32_1 = arith.constant 0 : i32
    return %c0_i32, %c0_i32_0 : i32, i32
  }
  func.func @transform_6(%arg0: i32) -> (i32, i32) {
    %c0_i32 = arith.constant 0 : i32
    %c0_i32_0 = arith.constant 0 : i32
    %c0_i32_1 = arith.constant 0 : i32
    return %c0_i32, %c0_i32_0 : i32, i32
  }
  func.func @transform_7(%arg0: i32) -> (i32, i32) {
    %c0_i32 = arith.constant 0 : i32
    %c0_i32_0 = arith.constant 0 : i32
    %c0_i32_1 = arith.constant 0 : i32
    return %c0_i32, %c0_i32_0 : i32, i32
  }
  func.func @transform_8(%arg0: i32) -> (i32, i32) {
    %c0_i32 = arith.constant 0 : i32
    %c0_i32_0 = arith.constant 0 : i32
    %c0_i32_1 = arith.constant 0 : i32
    return %c0_i32, %c0_i32_0 : i32, i32
  }
  func.func @transform_9(%arg0: i32) -> (i32, i32) {
    %c0_i32 = arith.constant 0 : i32
    %c0_i32_0 = arith.constant 0 : i32
    %c0_i32_1 = arith.constant 0 : i32
    return %c0_i32, %c0_i32_0 : i32, i32
  }
  func.func @transform_10(%arg0: i32) -> (i32, i32) {
    %c0_i32 = arith.constant 0 : i32
    %c0_i32_0 = arith.constant 0 : i32
    %c0_i32_1 = arith.constant 0 : i32
    return %c0_i32, %c0_i32_0 : i32, i32
  }
  func.func @transform_11(%arg0: i32) -> (i32, i32, i32) {
    %c0_i32 = arith.constant 0 : i32
    %c0_i32_0 = arith.constant 0 : i32
    %c0_i32_1 = arith.constant 0 : i32
    return %arg0, %c0_i32, %c0_i32_0 : i32, i32, i32
  }
}

</mosaic_0001>

<bundles_post_ra>
// kernel: _dqn_forward_impl.1
= control target key start
LH: loop header
LB: loop body
LE: loop exit
PB: predicated region body
PF: predicated region fallthrough
CT: control target
= control target key end

     0   :  { %16 = vsyncpa [#allocation3], 0  ;;  %s3941_s0 = inlined_call_operand.vmem [shape: u8[2,128,256], index: 0, kind: input, shape index: {}]   ;;  %s3942_s1 = inlined_call_operand.vmem [shape: bf16[256,32], index: 1, kind: input, shape index: {}]   ;;  %s3943_s2 = inlined_call_operand.vmem [shape: f32[1,32], index: 2, kind: input, shape index: {}]   ;;  %s3944_s3 = inlined_call_operand.vmem [shape: bf16[512,64], index: 3, kind: input, shape index: {}]   ;;  %s3945_s4 = inlined_call_operand.vmem [shape: f32[1,64], index: 4, kind: input, shape index: {}]   ;;  %s3946_s5 = inlined_call_operand.vmem [shape: bf16[576,64], index: 5, kind: input, shape index: {}]   ;;  %s3947_s6 = inlined_call_operand.vmem [shape: f32[1,64], index: 6, kind: input, shape index: {}]   ;;  %s3948_s7 = inlined_call_operand.vmem [shape: bf16[64,512], index: 7, kind: input, shape index: {}]   ;;  %s3949_s8 = inlined_call_operand.vmem [shape: f32[1,512], index: 8, kind: input, shape index: {}]   ;;  %s3950_s9 = inlined_call_operand.vmem [shape: bf16[512,128], index: 9, kind: input, shape index: {}]   ;;  %s3951_s10 = inlined_call_operand.vmem [shape: f32[1,128], index: 10, kind: input, shape index: {}]   ;;  %s3952_s11 = inlined_call_operand.hbm [shape: f32[2,2,128], index: 11, kind: output, shape index: {}]  }
   0x1   :  { %18 = vsyncpa [#allocation3 + $0x1], 0  ;;  %s3184_s17 = smov 0   ;;  %s3186_s18 = smov 0  }
   0x2   :  { %s3188_s19 = smov 0   ;;  %s3190_s20 = smov 0  }
   0x3 LB: > { %3954 = sst [smem:[#allocation5_spill]] %s3111_s19  ;;  %s3205_s21 = sadd.s32 4294967295, %s3115_s20   ;;  %s3115_s20 = sphi %s3190_s20, %s3962_s20   ;;  %s3111_s19 = sphi %s3188_s19, %s3959_s19   ;;  %s3107_s18 = sphi %s3186_s18, %s3961_s18   ;;  %s3103_s17 = sphi %s3184_s17, %s3960_s17  }
   0x4   : > { %s2392_s22 = sadd.s32 4294967294, %s3115_s20   ;;  %s3209_s23 = sadd.s32 1, %s3115_s20  }
   0x5   : > { %s267_s24 = sadd.s32 1, %s3111_s19  ;;  %s264_s25 = ssub.s32 %s3115_s20, %s3209_s23 }
   0x6   : > { %p277_p0 = scmp.ne.s32.totalorder %s3111_s19, %s3107_s18  ;;  %p265_p1 = scmp.eq.s32.totalorder %s264_s25, 0 }
   0x7   : > { %p278_p2 = scmp.eq.s32.totalorder %s3205_s21, 1  ;;  %p283_p3 = scmp.ne.s32.totalorder %s3107_s18, %s3103_s17 }
   0x8   : > { %p284_p4 = scmp.eq.s32.totalorder %s2392_s22, 1  ;;  %p2395_p7 = scmp.ge.s32.totalorder %s3115_s20, 1 }
   0x9   : > { %s3220_s26 = scalar_select %p265_p1, %s3111_s19, %s267_s24  }
   0xa   : > { %p3222_p5 = por %p278_p2, %p277_p0  ;;  %p3226_p6 = por %p284_p4, %p283_p3 }
   0xb   : > { %3955 = sst [smem:[#allocation6_spill]] %s3220_s26  ;;  %p340_p8 = scmp.lt.s32.totalorder %s3115_s20, 3 }
   0xd   : > { %p341_p9 = pnand %p2395_p7, %p340_p8 }
   0xe   : > { %v2913_v0 = vld [vmem:[%s3942_s1 + $0x40] sm:$0xff] (!%p341_p9)   ;;  %v2915_v2 = vld [vmem:[%s3942_s1 + $0x48] sm:$0xff] (!%p341_p9)   ;;  %p380_p10 = scmp.lt.s32.totalorder (!%p341_p9), %s3205_s21, 1  ;;  %v2917_v4 = vld [vmem:[%s3942_s1 + $0x50] sm:$0xff] (!%p341_p9)   ;;  %vm664_vm0 = vcmask (!%p341_p9), 1045504   ;;  %vm666_vm1 = vcmask (!%p341_p9), 1043456  }
   0xf   : > { %344 = sbr.rel (%p341_p9) target bundleno = 1515 (0x5eb), region = 64  ;;  %v2914_v1 = vld [vmem:[%s3942_s1] sm:$0xff] (!%p341_p9)   ;;  %2543 = vmatprep.subr.bf16.mxu0 (!%p341_p9), %v2913_v0  ;;  %v2916_v3 = vld [vmem:[%s3942_s1 + $0x8] sm:$0xff] (!%p341_p9)   ;;  %v2918_v5 = vld [vmem:[%s3942_s1 + $0x10] sm:$0xff] (!%p341_p9)   ;;  %s3119_s12 = smov (!%p341_p9), 96   ;;  %vm904_vm2 = vcmask (!%p341_p9), 261120  }
  0x10   : > { %2544 = vmatpush3.bf16.msra.mxu0 (!%p341_p9), %v2914_v1  ;;  %v2919_v6 = vld [vmem:[%s3942_s1 + $0x58] sm:$0xff] (!%p341_p9)   ;;  %v2921_v8 = vld [vmem:[%s3942_s1 + $0x60] sm:$0xff] (!%p341_p9)   ;;  %v2923_v10 = vld [vmem:[%s3942_s1 + $0x68] sm:$0xff] (!%p341_p9)   ;;  %vm908_vm3 = vcmask (!%p341_p9), 523264   ;;  %vm912_vm4 = vcmask (!%p341_p9), 785408   ;;  %vm3121_vm5 = vmmov (!%p341_p9), 0  }
  0x11   : > { %2545 = vmatprep.subr.bf16.mxu0 (!%p341_p9), %v2915_v2  ;;  %v2920_v7 = vld [vmem:[%s3942_s1 + $0x18] sm:$0xff] (!%p341_p9)   ;;  %v2922_v9 = vld [vmem:[%s3942_s1 + $0x20] sm:$0xff] (!%p341_p9)   ;;  %v2924_v13 = vld [vmem:[%s3942_s1 + $0x28] sm:$0xff] (!%p341_p9)   ;;  %s377_s26 = sand.u32 (!%p341_p9), 1, %s3107_s18  }
  0x12   : > { %v2925_v14 = vld [vmem:[%s3942_s1 + $0x70] sm:$0xff] (!%p341_p9)   ;;  %v2927_v16 = vld [vmem:[%s3942_s1 + $0x78] sm:$0xff] (!%p341_p9)   ;;  %v3298_v41 = vld [vmem:[%s3943_s2] ss:$0 sm:$0xff] (!%p341_p9)  ;;  %s2320_s22 = scalar_lea.sflag (!%p341_p9), [#allocation3], %s377_s26 }
  0x13   : > { %v2926_v15 = vld [vmem:[%s3942_s1 + $0x30] sm:$0xff] (!%p341_p9)   ;;  %v2928_v17 = vld [vmem:[%s3942_s1 + $0x38] sm:$0xff] (!%p341_p9)  }
  0x14   : > { %2546 = vmatpush3.bf16.msra.mxu0 (!%p341_p9), %v2916_v3 }
  0x15   : > { %2547 = vmatprep.subr.bf16.mxu0 (!%p341_p9), %v2917_v4 }
  0x16   : > { %s381_s29 = scalar_select %p380_p10, %s3205_s21, 1 }
  0x18   : > { %s2542_s15 = sshll.u32 %s381_s29, 6  ;;  %2548 = vmatpush3.bf16.msra.mxu0 %v2918_v5  ;;  %s3118_s29 = smov 32  }
  0x19   : > { %2549 = vmatprep.subr.bf16.mxu0 %v2919_v6  ;;  %s3264_s30 = scalar_lea.vmem %s3941_s0, %s2542_s15  ;;  %s2396_s15 = sshll.u32 %s377_s26, 1 }
  0x1a   : > { %v387_v11 = vld [vmem:[%s3264_s30 + $0x8] sm:$0xff]  ;;  %v386_v18 = vld [vmem:[%s3264_s30] sm:$0xff]  ;;  %v389_v21 = vld [vmem:[%s3264_s30 + $0x18] sm:$0xff]  ;;  %s379_s25 = scalar_lea.vmem [#allocation2], %s2396_s15 }
  0x1b   : > { %v395_v12 = vunpack.c.l.u8.bf16 %v387_v11  ;;  %v394_v19 = vunpack.c.l.u8.bf16 %v386_v18  ;;  %v397_v20 = vunpack.c.h.u8.bf16 %v387_v11  ;;  %v396_v22 = vunpack.c.h.u8.bf16 %v386_v18  ;;  %v388_v24 = vld [vmem:[%s3264_s30 + $0x10] sm:$0xff]  ;;  %v391_v27 = vld [vmem:[%s3264_s30 + $0x28] sm:$0xff]  ;;  %v390_v30 = vld [vmem:[%s3264_s30 + $0x20] sm:$0xff] }
  0x1c   : > { %2550 = vmatpush3.bf16.msra.mxu0 %v2920_v7  ;;  %v399_v23 = vunpack.c.l.u8.bf16 %v389_v21  ;;  %v398_v25 = vunpack.c.l.u8.bf16 %v388_v24  ;;  %v401_v26 = vunpack.c.h.u8.bf16 %v389_v21  ;;  %v400_v28 = vunpack.c.h.u8.bf16 %v388_v24  ;;  %v393_v33 = vld [vmem:[%s3264_s30 + $0x38] sm:$0xff]  ;;  %v392_v36 = vld [vmem:[%s3264_s30 + $0x30] sm:$0xff]  ;;  %s3117_s30 = smov 64  }
  0x1d   : > { %2551 = vmatprep.subr.bf16.mxu0 %v2921_v8  ;;  %577 = vmatprep.mubr.bf16.mxu0 %v395_v12  ;;  %v403_v29 = vunpack.c.l.u8.bf16 %v391_v27  ;;  %v402_v31 = vunpack.c.l.u8.bf16 %v390_v30  ;;  %v405_v32 = vunpack.c.h.u8.bf16 %v391_v27  ;;  %v404_v34 = vunpack.c.h.u8.bf16 %v390_v30 }
  0x1e   : > { %v407_v35 = vunpack.c.l.u8.bf16 %v393_v33  ;;  %v406_v37 = vunpack.c.l.u8.bf16 %v392_v36  ;;  %v409_v38 = vunpack.c.h.u8.bf16 %v393_v33  ;;  %v408_v39 = vunpack.c.h.u8.bf16 %v392_v36  ;;  %v2930_v33 = vld [vmem:[%s3944_s3] sm:$0xff]  }
  0x20   : > { %2552 = vmatpush3.bf16.msra.mxu0 %v2922_v9 }
  0x21   : > { %2553 = vmatprep.subr.bf16.mxu0 %v2923_v10 }
  0x24   : > { %2554 = vmatpush3.bf16.msra.mxu0 %v2924_v13 }
  0x25   : > { %2555 = vmatprep.subr.bf16.mxu0 %v2925_v14 }
  0x28   : > { %2556 = vmatpush3.bf16.msra.mxu0 %v2926_v15 }
  0x29   : > { %2557 = vmatprep.subr.bf16.mxu0 %v2927_v16 }
  0x2c   : > { %2558 = vmatpush3.bf16.msra.mxu0 %v2928_v17 }
  0x2f   : > { %578 = vmatmul.mubr.bf16.vlgmr.msra.gmra.mrb[0].mxu0 %v394_v19 }
  0x30   : > { %585 = vmatprep.mubr.bf16.mxu0 %v397_v20 }
  0x37   : > { %586 = vmatmul.mubr.bf16.gmra.mrb[4].mxu0 %v396_v22 }
  0x38   : > { %593 = vmatprep.mubr.bf16.mxu0 %v399_v23 }
  0x3f   : > { %594 = vmatmul.mubr.bf16.gmra.mrb[8].mxu0 %v398_v25 }
  0x40   : > { %601 = vmatprep.mubr.bf16.mxu0 %v401_v26 }
  0x47   : > { %602 = vmatmul.mubr.bf16.gmra.mrb[12].mxu0 %v400_v28 }
  0x48   : > { %609 = vmatprep.mubr.bf16.mxu0 %v403_v29 }
  0x4f   : > { %610 = vmatmul.mubr.bf16.gmra.mrb[16].mxu0 %v402_v31 }
  0x50   : > { %617 = vmatprep.mubr.bf16.mxu0 %v405_v32  ;;  %v2929_v32 = vld [vmem:[%s3944_s3 + $0x40] sm:$0xff]  }
  0x51   : > { %2607 = vmatprep.subr.bf16.mxu1 %v2929_v32  ;;  %v2936_v32 = vld [vmem:[%s3944_s3 + $0x18] sm:$0xff]  }
  0x52   : > { %2608 = vmatpush3.bf16.msra.mxu1 %v2930_v33 }
  0x57   : > { %618 = vmatmul.mubr.bf16.gmra.mrb[20].mxu0 %v404_v34  ;;  %v2931_v34 = vld [vmem:[%s3944_s3 + $0x48] sm:$0xff]  }
  0x58   : > { %625 = vmatprep.mubr.bf16.mxu0 %v407_v35  ;;  %2609 = vmatprep.subr.bf16.mxu1 %v2931_v34 }
  0x5f   : > { %626 = vmatmul.mubr.bf16.gmra.mrb[24].mxu0 %v406_v37 }
  0x60   : > { %633 = vmatprep.mubr.bf16.mxu0 %v409_v38 }
  0x67   : > { %634 = vmatmul.mubr.bf16.gmra.mrb[28].mxu0 %v408_v39 }
 0x102   : > { %v2559_v40 = vpop.f32.mrb[0].mxu0 }
 0x103   : > { %v2560_v42 = vpop.f32.mrb[1].mxu0 }
 0x104   : > { %v2561_v43 = vadd.f32 %v2560_v42, %v2559_v40  ;;  %v2562_v44 = vpop.f32.mrb[2].mxu0  ;;  %v2932_v40 = vld [vmem:[%s3944_s3 + $0x8] sm:$0xff]  }
 0x105   : > { %v2563_v45 = vpop.f32.mrb[3].mxu0  ;;  %2610 = vmatpush3.bf16.msra.mxu1 %v2932_v40 }
 0x106   : > { %v580_v46 = vadd.f32 %v2561_v43, %v3298_v41  ;;  %v2564_v47 = vadd.f32 %v2563_v45, %v2562_v44 }
 0x108   : > { %v642_v48 = vmax.f32 %v580_v46, 0.0  ;;  %v583_v49 = vadd.f32 %v2564_v47, %v3298_v41 }
 0x10a   : > { %v643_v50 = vmax.f32 %v583_v49, 0.0  ;;  %v2565_v51 = vpop.f32.mrb[4].mxu0  ;;  %v677_v53 = vrot.slane %v642_v48, 2 }
 0x10b   : > { %v2566_v52 = vpop.f32.mrb[5].mxu0 }
 0x10c   : > { %v659_v54 = vrot.slane %v643_v50, 2  ;;  %v2567_v55 = vadd.f32 %v2566_v52, %v2565_v51  ;;  %v2568_v56 = vpop.f32.mrb[6].mxu0  ;;  %v679_v57 = vrot.slane %v643_v50, 4 }
 0x10d   : > { %v2569_v58 = vpop.f32.mrb[7].mxu0 }
 0x10e   : > { %v588_v59 = vadd.f32 %v2567_v55, %v3298_v41  ;;  %v2570_v60 = vadd.f32 %v2569_v58, %v2568_v56  ;;  %v683_v61 = vsel %vm664_vm0, %v677_v53, %v679_v57  ;;  %v3305_v62 = vsel %vm664_vm0, %v642_v48, %v659_v54 }
 0x110   : > { %v3307_v63 = vmax.f32 %v588_v59, 0.0  ;;  %v591_v0 = vadd.f32 %v2570_v60, %v3298_v41 }
 0x112   : > { %v3311_v1 = vrot.slane %v3307_v63, 4  ;;  %v728_v2 = vrot.slane %v3307_v63, 2  ;;  %v645_v3 = vmax.f32 %v591_v0, 0.0  ;;  %v2571_v4 = vpop.f32.mrb[8].mxu0  ;;  %v681_v5 = vrot.slane %v3307_v63, 6  ;;  %v2939_v63 = vld [vmem:[%s3944_s3 + $0x68] sm:$0xff]  }
 0x113   : > { %v2572_v6 = vpop.f32.mrb[9].mxu0 }
 0x114   : > { %v3315_v7 = vrot.slane %v645_v3, 4  ;;  %v3317_v8 = vrot.slane %v645_v3, 6  ;;  %v2573_v9 = vadd.f32 %v2572_v6, %v2571_v4  ;;  %v2574_v10 = vpop.f32.mrb[10].mxu0  ;;  %v684_v11 = vsel %vm666_vm1, %v679_v57, %v681_v5 }
 0x115   : > { %v2575_v12 = vpop.f32.mrb[11].mxu0  ;;  %v2813_v13 = vpack.i.bf16 %v684_v11, %v683_v61  ;;  %v3324_v14 = vsel %vm664_vm0, %v659_v54, %v3311_v1  ;;  %v3328_v15 = vsel %vm666_vm1, %v659_v54, %v3311_v1  ;;  %v3331_v16 = vsel %vm664_vm0, %v643_v50, %v728_v2 }
 0x116   : > { %v596_v17 = vadd.f32 %v2573_v9, %v3298_v41  ;;  %v2576_v18 = vadd.f32 %v2575_v12, %v2574_v10  ;;  %v3337_v19 = vsel %vm666_vm1, %v3311_v1, %v3317_v8  ;;  %v3341_v20 = vsel %vm666_vm1, %v728_v2, %v3315_v7 }
 0x117   : > { %2814 = vrot.lane.b32.xlu1 %v2813_v13, %s3117_s30  ;;  %v2868_v21 = vpack.i.bf16 %v3337_v19, %v3324_v14  ;;  %v2933_v13 = vld [vmem:[%s3944_s3 + $0x50] sm:$0xff]  }
 0x118   : > { %v646_v22 = vmax.f32 %v596_v17, 0.0  ;;  %v599_v23 = vadd.f32 %v2576_v18, %v3298_v41  ;;  %v2934_v17 = vld [vmem:[%s3944_s3 + $0x10] sm:$0xff]   ;;  %2611 = vmatprep.subr.bf16.mxu1 %v2933_v13 }
 0x119   : > { %2612 = vmatpush3.bf16.msra.mxu1 %v2934_v17 }
 0x11a   : > { %v647_v24 = vmax.f32 %v599_v23, 0.0  ;;  %v2577_v25 = vpop.f32.mrb[12].mxu0  ;;  %v686_v26 = vrot.slane %v646_v22, 2 }
 0x11b   : > { %v2578_v27 = vpop.f32.mrb[13].mxu0 }
 0x11c   : > { %v688_v28 = vrot.slane %v647_v24, 4  ;;  %v2579_v29 = vadd.f32 %v2578_v27, %v2577_v25  ;;  %v2580_v30 = vpop.f32.mrb[14].mxu0  ;;  %v669_v31 = vrot.slane %v647_v24, 2 }
 0x11d   : > { %v2581_v35 = vpop.f32.mrb[15].mxu0 }
 0x11e   : > { %v604_v36 = vadd.f32 %v2579_v29, %v3298_v41  ;;  %v2582_v37 = vadd.f32 %v2581_v35, %v2580_v30  ;;  %v674_v38 = vsel %vm664_vm0, %v646_v22, %v669_v31  ;;  %v3359_v39 = vsel %vm664_vm0, %v686_v26, %v688_v28 }
 0x120   : > { %v3364_v42 = vmax.f32 %v604_v36, 0.0  ;;  %v607_v43 = vadd.f32 %v2582_v37, %v3298_v41 }
 0x122   : > { %v3368_v44 = vrot.slane %v3364_v42, 4  ;;  %v690_v45 = vrot.slane %v3364_v42, 6  ;;  %v735_v46 = vrot.slane %v3364_v42, 2  ;;  %v649_v47 = vmax.f32 %v607_v43, 0.0  ;;  %v2583_v48 = vpop.f32.mrb[16].mxu0 }
 0x123   : > { %v2584_v49 = vpop.f32.mrb[17].mxu0 }
 0x124   : > { %v3372_v50 = vrot.slane %v649_v47, 4  ;;  %v3374_v51 = vrot.slane %v649_v47, 6  ;;  %v2585_v52 = vadd.f32 %v2584_v49, %v2583_v48  ;;  %v2586_v53 = vpop.f32.mrb[18].mxu0  ;;  %v675_v54 = vsel %vm666_vm1, %v669_v31, %v3368_v44  ;;  %v2938_v48 = vld [vmem:[%s3944_s3 + $0x20] sm:$0xff]  }
 0x125   : > { %v2587_v55 = vpop.f32.mrb[19].mxu0  ;;  %v2818_v56 = vpack.i.bf16 %v675_v54, %v674_v38  ;;  %v3381_v57 = vsel %vm666_vm1, %v688_v28, %v690_v45  ;;  %v3384_v58 = vsel %vm664_vm0, %v647_v24, %v735_v46  ;;  %v3388_v59 = vsel %vm664_vm0, %v669_v31, %v3368_v44  ;;  %v2935_v31 = vld [vmem:[%s3944_s3 + $0x58] sm:$0xff]  }
 0x126   : > { %v612_v60 = vadd.f32 %v2585_v52, %v3298_v41  ;;  %v2588_v61 = vadd.f32 %v2587_v55, %v2586_v53  ;;  %v2838_v0 = vpack.i.bf16 %v3381_v57, %v3359_v39  ;;  %v3395_v2 = vsel %vm666_vm1, %v735_v46, %v3372_v50  ;;  %2613 = vmatprep.subr.bf16.mxu1 %v2935_v31  ;;  %v2937_v46 = vld [vmem:[%s3944_s3 + $0x60] sm:$0xff]   ;;  %v2943_v39 = vld [vmem:[%s3944_s3 + $0x78] sm:$0xff]  }
 0x127   : > { %2819 = vrot.lane.b32.xlu0 %v2818_v56, %s3118_s29  ;;  %v2858_v3 = vpack.i.bf16 %v3395_v2, %v3384_v58  ;;  %v3403_v4 = vsel %vm666_vm1, %v3368_v44, %v3374_v51  ;;  %2614 = vmatpush3.bf16.msra.mxu1 %v2936_v32 }
 0x128   : > { %v650_v6 = vmax.f32 %v612_v60, 0.0  ;;  %v615_v9 = vadd.f32 %v2588_v61, %v3298_v41  ;;  %v2883_v10 = vpack.i.bf16 %v3403_v4, %v3388_v59  ;;  %2615 = vmatprep.subr.bf16.mxu1 %v2937_v46 }
 0x12a   : > { %v651_v11 = vmax.f32 %v615_v9, 0.0  ;;  %v2589_v12 = vpop.f32.mrb[20].mxu0  ;;  %v711_v22 = vrot.slane %v650_v6, 2 }
 0x12b   : > { %v2590_v18 = vpop.f32.mrb[21].mxu0  ;;  %2616 = vmatpush3.bf16.msra.mxu1 %v2938_v48  ;;  %v2944_v48 = vld [vmem:[%s3944_s3 + $0x38] sm:$0xff]  }
 0x12c   : > { %v695_v23 = vrot.slane %v651_v11, 2  ;;  %v713_v24 = vrot.slane %v651_v11, 4  ;;  %v2591_v25 = vadd.f32 %v2590_v18, %v2589_v12  ;;  %v2592_v26 = vpop.f32.mrb[22].mxu0  ;;  %2617 = vmatprep.subr.bf16.mxu1 %v2939_v63 }
 0x12d   : > { %v2593_v27 = vpop.f32.mrb[23].mxu0 }
 0x12e   : > { %v620_v28 = vadd.f32 %v2591_v25, %v3298_v41  ;;  %v2594_v29 = vadd.f32 %v2593_v27, %v2592_v26  ;;  %v717_v30 = vsel %vm664_vm0, %v711_v22, %v713_v24  ;;  %v3423_v33 = vsel %vm664_vm0, %v650_v6, %v695_v23 }
 0x130   : > { %v652_v34 = vmax.f32 %v620_v28, 0.0  ;;  %v623_v35 = vadd.f32 %v2594_v29, %v3298_v41  ;;  %v2941_v29 = vld [vmem:[%s3944_s3 + $0x70] sm:$0xff]  }
 0x132   : > { %v3426_v36 = vrot.slane %v652_v34, 4  ;;  %v715_v37 = vrot.slane %v652_v34, 6  ;;  %v750_v38 = vrot.slane %v652_v34, 2  ;;  %v653_v40 = vmax.f32 %v623_v35, 0.0  ;;  %v2595_v43 = vpop.f32.mrb[24].mxu0 }
 0x133   : > { %v2596_v47 = vpop.f32.mrb[25].mxu0 }
 0x134   : > { %v3434_v49 = vrot.slane %v653_v40, 4  ;;  %v3436_v52 = vrot.slane %v653_v40, 6  ;;  %v2597_v53 = vadd.f32 %v2596_v47, %v2595_v43  ;;  %v2598_v54 = vpop.f32.mrb[26].mxu0  ;;  %v718_v55 = vsel %vm666_vm1, %v713_v24, %v715_v37 }
 0x135   : > { %v2599_v56 = vpop.f32.mrb[27].mxu0  ;;  %v2823_v60 = vpack.i.bf16 %v718_v55, %v717_v30  ;;  %v2848_v61 = vpack.i.bf16 %v681_v5, %v715_v37  ;;  %v766_v6 = vsel %vm664_vm0, %v695_v23, %v3426_v36  ;;  %v3444_v9 = vsel %vm664_vm0, %v651_v11, %v750_v38  ;;  %v2940_v5 = vld [vmem:[%s3944_s3 + $0x28] sm:$0xff]  }
 0x136   : > { %v628_v12 = vadd.f32 %v2597_v53, %v3298_v41  ;;  %v2600_v13 = vadd.f32 %v2599_v56, %v2598_v54  ;;  %v767_v17 = vsel %vm666_vm1, %v3426_v36, %v3436_v52  ;;  %v2893_v18 = vpack.i.bf16 %v3317_v8, %v3436_v52  ;;  %2618 = vmatpush3.bf16.msra.mxu1 %v2940_v5 }
 0x137   : > { %2824 = vrot.lane.b32.xlu1 %v2823_v60, %s3117_s30  ;;  %v2863_v11 = vpack.i.bf16 %v767_v17, %v766_v6  ;;  %v3461_v22 = vsel %vm666_vm1, %v750_v38, %v3434_v49  ;;  %v3465_v24 = vsel %vm666_vm1, %v695_v23, %v3426_v36  ;;  %2619 = vmatprep.subr.bf16.mxu1 %v2941_v29  ;;  %v2942_v38 = vld [vmem:[%s3944_s3 + $0x30] sm:$0xff]  }
 0x138   : > { %v654_v25 = vmax.f32 %v628_v12, 0.0  ;;  %v631_v26 = vadd.f32 %v2600_v13, %v3298_v41 }
 0x13a   : > { %v655_v27 = vmax.f32 %v631_v26, 0.0  ;;  %v2601_v28 = vpop.f32.mrb[28].mxu0  ;;  %v720_v23 = vrot.slane %v654_v25, 2  ;;  %2620 = vmatpush3.bf16.msra.mxu1 %v2942_v38 }
 0x13b   : > { %v2602_v30 = vpop.f32.mrb[29].mxu0  ;;  %2839 = vrot.lane.b32.xlu1 %v2838_v0, %s3119_s12  ;;  %2621 = vmatprep.subr.bf16.mxu1 %v2943_v39 }
 0x13c   : > { %v703_v31 = vrot.slane %v655_v27, 2  ;;  %v722_v32 = vrot.slane %v655_v27, 4  ;;  %v2603_v34 = vadd.f32 %v2602_v30, %v2601_v28  ;;  %v2604_v35 = vpop.f32.mrb[30].mxu0 }
 0x13d   : > { %v2605_v37 = vpop.f32.mrb[31].mxu0 }
 0x13e   : > { %v636_v40 = vadd.f32 %v2603_v34, %v3298_v41  ;;  %v2606_v43 = vadd.f32 %v2605_v37, %v2604_v35  ;;  %v708_v46 = vsel %vm664_vm0, %v654_v25, %v703_v31  ;;  %v726_v47 = vsel %vm664_vm0, %v720_v23, %v722_v32  ;;  %2622 = vmatpush3.bf16.msra.mxu1 %v2944_v48 }
 0x13f   : > { %2849 = vrot.lane.b32.xlu1 %v2848_v61, %s3117_s30 }
 0x140   : > { %v656_v57 = vmax.f32 %v636_v40, 0.0  ;;  %v639_v0 = vadd.f32 %v2606_v43, %v3298_v41  ;;  %v2945_v41 = vld [vmem:[%s3944_s3 + $0xc0] sm:$0xff]  }
 0x141   : > { %2635 = vmatprep.subr.bf16.mxu1 %v2945_v41 }
 0x142   : > { %v706_v53 = vrot.slane %v656_v57, 4  ;;  %v724_v54 = vrot.slane %v656_v57, 6  ;;  %v757_v55 = vrot.slane %v656_v57, 2  ;;  %v657_v56 = vmax.f32 %v639_v0, 0.0 }
 0x143   : > { %2864 = vrot.lane.b32.xlu1 %v2863_v11, %s3117_s30 }
 0x144   : > { %v760_v60 = vrot.slane %v657_v56, 4  ;;  %v768_v6 = vrot.slane %v657_v56, 6  ;;  %v709_v61 = vsel %vm666_vm1, %v703_v31, %v706_v53  ;;  %v762_v12 = vsel %vm664_vm0, %v655_v27, %v757_v55 }
 0x145   : > { %v2828_v13 = vpack.i.bf16 %v709_v61, %v708_v46  ;;  %v727_v17 = vsel %vm666_vm1, %v722_v32, %v724_v54  ;;  %v770_v63 = vsel %vm664_vm0, %v703_v31, %v706_v53  ;;  %v2843_v5 = vpack.i.bf16 %v3368_v44, %v706_v53 }
 0x146   : > { %v763_v11 = vsel %vm666_vm1, %v757_v55, %v760_v60  ;;  %v2833_v25 = vpack.i.bf16 %v727_v17, %v726_v47  ;;  %v771_v26 = vsel %vm666_vm1, %v706_v53, %v768_v6  ;;  %v2888_v28 = vpack.i.bf16 %v3372_v50, %v760_v60 }
 0x147   : > { %2829 = vrot.lane.b32.xlu0 %v2828_v13, %s3118_s29  ;;  %v2873_v27 = vpack.i.bf16 %v763_v11, %v762_v12  ;;  %v2878_v29 = vpack.i.bf16 %v771_v26, %v770_v63  ;;  %v2853_v30 = vpack.i.bf16 %v690_v45, %v724_v54  ;;  %v2898_v23 = vpack.i.bf16 %v3374_v51, %v768_v6  ;;  %v2947_v11 = vld [vmem:[%s3944_s3 + $0xc8] sm:$0xff]  }
 0x149   : > { %2874 = vrot.lane.b32.xlu1 %v2873_v27, %s3118_s29 }
 0x14b   : > { %2834 = vrot.lane.b32.xlu0 %v2833_v25, %s3119_s12 }
 0x14d   : > { %2879 = vrot.lane.b32.xlu1 %v2878_v29, %s3119_s12 }
 0x14f   : > { %2844 = vrot.lane.b32.xlu0 %v2843_v5, %s3118_s29 }
 0x151   : > { %2889 = vrot.lane.b32.xlu1 %v2888_v28, %s3118_s29 }
 0x153   : > { %2854 = vrot.lane.b32.xlu0 %v2853_v30, %s3119_s12 }
 0x155   : > { %2899 = vrot.lane.b32.xlu1 %v2898_v23, %s3119_s12 }
 0x157   : > { %2859 = vrot.lane.b32.xlu0 %v2858_v3, %s3118_s29  ;;  %s2539_s29 = sshll.u32 %s3205_s21, 5  ;;  %s3123_s21 = smov [#allocation2]  }
 0x158   : > { %s3899_s16 = scalar_lea.hbm %s3952_s11, %s2539_s29  ;;  %s3057_s15 = sshll.u32 %s3123_s21, 4  ;;  %s3058_s15 = int_to_ptr.vmem [resolvable:$false] %s3057_s15 }
 0x15b   : > { %2869 = vrot.lane.b32.xlu0 %v2868_v21, %s3117_s30 }
 0x15f   : > { %2884 = vrot.lane.b32.xlu0 %v2883_v10, %s3119_s12  ;;  %s2333_s12 = sshll.u32 %s379_s25, 4  ;;  %s3901_s12 = int_to_ptr.vmem [resolvable:$true] %s2333_s12 }
 0x160   : > { %s3053_s19 = scalar_lea.vmem %s3901_s12, 32  ;;  %p3060_p0 = scmp.lt.s32.totalorder %s3901_s12, %s3058_s15 }
 0x161   : > { %p3054_p11 = scmp.ne.s32.totalorder %s3901_s12, %s3053_s19 }
 0x163   : > { %2894 = vrot.lane.b32.xlu0 %v2893_v18, %s3117_s30  ;;  %p3055_p12 = pnand %p3054_p11, %p3222_p5 }
 0x165   : > { %p3056_p13 = pneg %p3055_p12 }
 0x189   : > { %v2815_v42 = vpop.permute.xlu1 %2814 }
 0x18a   : > { %v2817_v21 = vunpack.i.h.bf16 %v2815_v42  ;;  %v2816_v58 = vunpack.i.l.bf16 %v2815_v42 }
 0x199   : > { %v2820_v44 = vpop.permute.xlu0 %2819 }
 0x19a   : > { %v2822_v45 = vunpack.i.h.bf16 %v2820_v44  ;;  %v2821_v50 = vunpack.i.l.bf16 %v2820_v44  ;;  %v2948_v44 = vld [vmem:[%s3944_s3 + $0x88] sm:$0xff]  }
 0x19c   : > { %v905_v14 = vsel %vm904_vm2, %v3305_v62, %v2821_v50  ;;  %v906_v19 = vsel %vm904_vm2, %v3328_v15, %v2822_v45 }
 0x19d   : > { %v909_v3 = vsel %vm908_vm3, %v905_v14, %v2816_v58  ;;  %v910_v4 = vsel %vm908_vm3, %v906_v19, %v2817_v21 }
 0x1a9   : > { %v2825_v51 = vpop.permute.xlu1 %2824 }
 0x1aa   : > { %v2827_v46 = vunpack.i.h.bf16 %v2825_v51  ;;  %v2826_v47 = vunpack.i.l.bf16 %v2825_v51  ;;  %v2949_v51 = vld [vmem:[%s3944_s3 + $0xd0] sm:$0xff]  }
 0x1ad   : > { %v2840_v59 = vpop.permute.xlu1 %2839 }
 0x1ae   : > { %v2842_v2 = vunpack.i.h.bf16 %v2840_v59  ;;  %v2841_v8 = vunpack.i.l.bf16 %v2840_v59 }
 0x1b0   : > { %v913_v10 = vsel %vm912_vm4, %v909_v3, %v2841_v8  ;;  %v914_v52 = vsel %vm912_vm4, %v910_v4, %v2842_v2  ;;  %v2950_v2 = vld [vmem:[%s3944_s3 + $0x90] sm:$0xff]   ;;  %v2951_v8 = vld [vmem:[%s3944_s3 + $0xd8] sm:$0xff]  }
 0x1b1   : > { %v2850_v18 = vpop.permute.xlu1 %2849  ;;  %v943_v62 = vpack.c.bf16 %v914_v52, %v913_v10  ;;  %v2952_v4 = vld [vmem:[%s3944_s3 + $0x98] sm:$0xff]  }
 0x1b2   : > { %v2852_v30 = vunpack.i.h.bf16 %v2850_v18  ;;  %v2851_v23 = vunpack.i.l.bf16 %v2850_v18  ;;  %v2953_v18 = vld [vmem:[%s3944_s3 + $0xe0] sm:$0xff]  }
 0x1b5   : > { %v2865_v31 = vpop.permute.xlu1 %2864 }
 0x1b6   : > { %v2867_v54 = vunpack.i.h.bf16 %v2865_v31  ;;  %v2866_v55 = vunpack.i.l.bf16 %v2865_v31 }
 0x1b9   : > { %v2830_v32 = vpop.permute.xlu0 %2829 }
 0x1ba   : > { %v2832_v15 = vunpack.i.h.bf16 %v2830_v32  ;;  %v2831_v34 = vunpack.i.l.bf16 %v2830_v32 }
 0x1bb   : > { %v2875_v35 = vpop.permute.xlu1 %2874 }
 0x1bc   : > { %v2877_v37 = vunpack.i.h.bf16 %v2875_v35  ;;  %v2876_v38 = vunpack.i.l.bf16 %v2875_v35  ;;  %v916_v40 = vsel %vm904_vm2, %v3423_v33, %v2831_v34  ;;  %v917_v43 = vsel %vm904_vm2, %v3465_v24, %v2832_v15  ;;  %v2954_v15 = vld [vmem:[%s3944_s3 + $0xa0] sm:$0xff]  }
 0x1bd   : > { %v2835_v39 = vpop.permute.xlu0 %2834  ;;  %v919_v60 = vsel %vm908_vm3, %v916_v40, %v2826_v47  ;;  %v920_v33 = vsel %vm908_vm3, %v917_v43, %v2827_v46  ;;  %v2955_v40 = vld [vmem:[%s3944_s3 + $0xe8] sm:$0xff]  }
 0x1be   : > { %v935_v57 = vsel %vm904_vm2, %v3461_v22, %v2877_v37  ;;  %v934_v0 = vsel %vm904_vm2, %v3444_v9, %v2876_v38  ;;  %v2837_v48 = vunpack.i.h.bf16 %v2835_v39  ;;  %v2836_v53 = vunpack.i.l.bf16 %v2835_v39  ;;  %v2946_v9 = vld [vmem:[%s3944_s3 + $0x80] sm:$0xff]  }
 0x1bf   : > { %v2880_v56 = vpop.permute.xlu1 %2879  ;;  %v937_v13 = vsel %vm908_vm3, %v934_v0, %v2866_v55  ;;  %v938_v17 = vsel %vm908_vm3, %v935_v57, %v2867_v54  ;;  %v2958_v55 = vld [vmem:[%s3944_s3 + $0xb0] sm:$0xff]  }
 0x1c0   : > { %v2882_v6 = vunpack.i.h.bf16 %v2880_v56  ;;  %v2881_v24 = vunpack.i.l.bf16 %v2880_v56  ;;  %v922_v61 = vsel %vm912_vm4, %v919_v60, %v2836_v53  ;;  %v923_v12 = vsel %vm912_vm4, %v920_v33, %v2837_v48  ;;  %v2957_v48 = vld [vmem:[%s3944_s3 + $0xf0] sm:$0xff]   ;;  %v2959_v56 = vld [vmem:[%s3944_s3 + $0xf8] sm:$0xff]  }
 0x1c1   : > { %v2845_v41 = vpop.permute.xlu0 %2844  ;;  %v944_v22 = vpack.c.bf16 %v923_v12, %v922_v61 }
 0x1c2   : > { %v2847_v63 = vunpack.i.h.bf16 %v2845_v41  ;;  %v2846_v5 = vunpack.i.l.bf16 %v2845_v41  ;;  %v940_v25 = vsel %vm912_vm4, %v937_v13, %v2881_v24  ;;  %v941_v26 = vsel %vm912_vm4, %v938_v17, %v2882_v6  ;;  %v2960_v24 = vld [vmem:[%s3944_s3 + $0xb8] sm:$0xff]  }
 0x1c3   : > { %1246 = vmatprep.mubr.bf16.mxu1 %v944_v22  ;;  %v946_v28 = vpack.c.bf16 %v941_v26, %v940_v25  ;;  %v2890_v57 = vpop.permute.xlu1 %2889  ;;  %v2962_v25 = vld [vmem:[%s3946_s5] sm:$0xff]   ;;  %v2964_v26 = vld [vmem:[%s3946_s5 + $0x8] sm:$0xff]  }
 0x1c4   : > { %v907_v27 = vsel %vm904_vm2, %v3311_v1, %v2847_v63  ;;  %v918_v29 = vsel %vm904_vm2, %v3426_v36, %v2846_v5  ;;  %1247 = vmatmul.mubr.bf16.vlgmr.msra.gmra.mrb[0].mxu1 %v943_v62  ;;  %v2891_v53 = vunpack.i.l.bf16 %v2890_v57  ;;  %v2892_v12 = vunpack.i.h.bf16 %v2890_v57  ;;  %v2989_v57 = vld [vmem:[%s3946_s5 + $0xf0] sm:$0xff]  }
 0x1c5   : > { %2636 = vmatpush3.bf16.msra.mxu1 %v2946_v9  ;;  %v2855_v42 = vpop.permute.xlu0 %2854  ;;  %v921_v1 = vsel %vm908_vm3, %v918_v29, %v2851_v23  ;;  %v911_v36 = vsel %vm908_vm3, %v907_v27, %v2852_v30  ;;  %v2972_v27 = vld [vmem:[%s3946_s5 + $0x80] sm:$0xff]   ;;  %v2965_v29 = vld [vmem:[%s3946_s5 + $0x50] sm:$0xff]   ;;  %v2973_v30 = vld [vmem:[%s3946_s5 + $0xc8] sm:$0xff]  }
 0x1c6   : > { %v2857_v45 = vunpack.i.h.bf16 %v2855_v42  ;;  %v2856_v50 = vunpack.i.l.bf16 %v2855_v42  ;;  %2637 = vmatprep.subr.bf16.mxu1 %v2947_v11  ;;  %v936_v33 = vsel %vm904_vm2, %v3434_v49, %v2891_v53  ;;  %v927_v9 = vsel %vm904_vm2, %v3315_v7, %v2892_v12  ;;  %v2961_v11 = vld [vmem:[%s3946_s5 + $0x40] sm:$0xff]   ;;  %v2963_v7 = vld [vmem:[%s3946_s5 + $0x48] sm:$0xff]   ;;  %v2966_v42 = vld [vmem:[%s3946_s5 + $0x10] sm:$0xff]  }
 0x1c7   : > { %v2900_v60 = vpop.permute.xlu1 %2899  ;;  %2663 = vmatprep.subr.bf16.mxu0 %v2961_v11  ;;  %v2975_v23 = vld [vmem:[%s3946_s5 + $0x88] sm:$0xff]  }
 0x1c8   : > { %v924_v14 = vsel %vm912_vm4, %v921_v1, %v2856_v50  ;;  %v915_v19 = vsel %vm912_vm4, %v911_v36, %v2857_v45  ;;  %v2901_v61 = vunpack.i.l.bf16 %v2900_v60  ;;  %v2902_v17 = vunpack.i.h.bf16 %v2900_v60  ;;  %2664 = vmatpush3.bf16.msra.mxu0 %v2962_v25  ;;  %v2967_v45 = vld [vmem:[%s3946_s5 + $0x58] sm:$0xff]   ;;  %v2978_v50 = vld [vmem:[%s3946_s5 + $0x90] sm:$0xff]   ;;  %v2969_v36 = vld [vmem:[%s3946_s5 + $0x60] sm:$0xff]  }
 0x1c9   : > { %2638 = vmatpush3.bf16.msra.mxu1 %v2948_v44  ;;  %v2860_v21 = vpop.permute.xlu0 %2859  ;;  %v948_v58 = vpack.c.bf16 %v924_v14, %v924_v14  ;;  %v947_v59 = vpack.c.bf16 %v915_v19, %v915_v19  ;;  %2665 = vmatprep.subr.bf16.mxu0 %v2963_v7  ;;  %v2977_v44 = vld [vmem:[%s3946_s5 + $0xd0] sm:$0xff]   ;;  %v2979_v1 = vld [vmem:[%s3946_s5 + $0xd8] sm:$0xff]   ;;  %v2970_v19 = vld [vmem:[%s3946_s5 + $0x20] sm:$0xff]  }
 0x1ca   : > { %2639 = vmatprep.subr.bf16.mxu1 %v2949_v51  ;;  %v2862_v10 = vunpack.i.h.bf16 %v2860_v21  ;;  %v2861_v52 = vunpack.i.l.bf16 %v2860_v21  ;;  %v2968_v51 = vld [vmem:[%s3946_s5 + $0x18] sm:$0xff]   ;;  %v2983_v21 = vld [vmem:[%s3946_s5 + $0xe0] sm:$0xff]  }
 0x1cb   : > { %1254 = vmatprep.mubr.bf16.mxu1 %v948_v58  ;;  %v2981_v14 = vld [vmem:[%s3946_s5 + $0x98] sm:$0xff]   ;;  %v2974_v58 = vld [vmem:[%s3946_s5 + $0x68] sm:$0xff]  }
 0x1cc   : > { %1255 = vmatmul.mubr.bf16.gmra.mrb[4].mxu1 %v947_v59  ;;  %v925_v34 = vsel %vm904_vm2, %v3331_v16, %v2861_v52  ;;  %v926_v35 = vsel %vm904_vm2, %v3341_v20, %v2862_v10  ;;  %v2956_v20 = vld [vmem:[%s3944_s3 + $0xa8] sm:$0xff]   ;;  %2666 = vmatpush3.bf16.msra.mxu0 %v2964_v26  ;;  %v2984_v59 = vld [vmem:[%s3946_s5 + $0xa0] sm:$0xff]   ;;  %v2982_v10 = vld [vmem:[%s3946_s5 + $0x30] sm:$0xff]  }
 0x1cd   : > { %2640 = vmatpush3.bf16.msra.mxu1 %v2950_v2  ;;  %v2870_v3 = vpop.permute.xlu0 %2869  ;;  %1294 = vmatprep.mubr.bf16.mxu1 %v946_v28  ;;  %v2971_v28 = vld [vmem:[%s3946_s5 + $0xc0] sm:$0xff]   ;;  %v2976_v2 = vld [vmem:[%s3946_s5 + $0x28] sm:$0xff]   ;;  %v2986_v52 = vld [vmem:[%s3946_s5 + $0x78] sm:$0xff]  }
 0x1ce   : > { %2641 = vmatprep.subr.bf16.mxu1 %v2951_v8  ;;  %v2872_v62 = vunpack.i.h.bf16 %v2870_v3  ;;  %v2871_v31 = vunpack.i.l.bf16 %v2870_v3  ;;  %2667 = vmatprep.subr.bf16.mxu0 %v2965_v29  ;;  %v2985_v8 = vld [vmem:[%s3946_s5 + $0xe8] sm:$0xff]   ;;  %v2980_v3 = vld [vmem:[%s3946_s5 + $0x70] sm:$0xff]  }
 0x1d0   : > { %v929_v43 = vsel %vm908_vm3, %v926_v35, %v2872_v62  ;;  %v928_v46 = vsel %vm908_vm3, %v925_v34, %v2871_v31  ;;  %2668 = vmatpush3.bf16.msra.mxu0 %v2966_v42 }
 0x1d1   : > { %2642 = vmatpush3.bf16.msra.mxu1 %v2952_v4  ;;  %v2885_v32 = vpop.permute.xlu0 %2884  ;;  %2669 = vmatprep.subr.bf16.mxu0 %v2967_v45  ;;  %v2987_v4 = vld [vmem:[%s3946_s5 + $0xa8] sm:$0xff]  }
 0x1d2   : > { %v2887_v37 = vunpack.i.h.bf16 %v2885_v32  ;;  %v2886_v38 = vunpack.i.l.bf16 %v2885_v32  ;;  %2643 = vmatprep.subr.bf16.mxu1 %v2953_v18  ;;  %v2988_v18 = vld [vmem:[%s3946_s5 + $0x38] sm:$0xff]  }
 0x1d4   : > { %v931_v47 = vsel %vm912_vm4, %v928_v46, %v2886_v38  ;;  %v932_v39 = vsel %vm912_vm4, %v929_v43, %v2887_v37  ;;  %2670 = vmatpush3.bf16.msra.mxu0 %v2968_v51  ;;  %v2416_v46 = vld [vmem:[%s3945_s4] ss:$0 sm:$0xff] }
 0x1d5   : > { %v945_v16 = vpack.c.bf16 %v932_v39, %v931_v47  ;;  %2644 = vmatpush3.bf16.msra.mxu1 %v2954_v15  ;;  %v2895_v0 = vpop.permute.xlu0 %2894  ;;  %2671 = vmatprep.subr.bf16.mxu0 %v2969_v36 }
 0x1d6   : > { %2645 = vmatprep.subr.bf16.mxu1 %v2955_v40  ;;  %v2896_v54 = vunpack.i.l.bf16 %v2895_v0  ;;  %v2897_v41 = vunpack.i.h.bf16 %v2895_v0 }
 0x1d8   : > { %v939_v6 = vsel %vm908_vm3, %v936_v33, %v2896_v54  ;;  %v930_v49 = vsel %vm908_vm3, %v927_v9, %v2897_v41  ;;  %2672 = vmatpush3.bf16.msra.mxu0 %v2970_v19 }
 0x1d9   : > { %2646 = vmatpush3.bf16.msra.mxu1 %v2956_v20  ;;  %v942_v22 = vsel %vm912_vm4, %v939_v6, %v2901_v61  ;;  %v933_v63 = vsel %vm912_vm4, %v930_v49, %v2902_v17  ;;  %2673 = vmatprep.subr.bf16.mxu0 %v2974_v58  ;;  %v2990_v20 = vld [vmem:[%s3946_s5 + $0xb0] sm:$0xff]   ;;  %v3120_v61 = vmov 0.0  }
 0x1da   : > { %2647 = vmatprep.subr.bf16.mxu1 %v2957_v48  ;;  %v950_v13 = vpack.c.bf16 %v942_v22, %v942_v22  ;;  %v949_v5 = vpack.c.bf16 %v933_v63, %v933_v63 }
 0x1dc   : > { %2674 = vmatpush3.bf16.msra.mxu0 %v2976_v2 }
 0x1dd   : > { %2648 = vmatpush3.bf16.msra.mxu1 %v2958_v55  ;;  %2675 = vmatprep.subr.bf16.mxu0 %v2980_v3  ;;  %v2994_v3 = vld [vmem:[%s3946_s5 + $0x108] sm:$0xff]  }
 0x1de   : > { %2649 = vmatprep.subr.bf16.mxu1 %v2959_v56  ;;  %v2991_v56 = vld [vmem:[%s3946_s5 + $0xf8] sm:$0xff]  }
 0x1e0   : > { %2676 = vmatpush3.bf16.msra.mxu0 %v2982_v10  ;;  %v2996_v10 = vld [vmem:[%s3946_s5 + $0x118] sm:$0xff]  }
 0x1e1   : > { %2650 = vmatpush3.bf16.msra.mxu1 %v2960_v24  ;;  %2677 = vmatprep.subr.bf16.mxu0 %v2986_v52  ;;  %v2992_v24 = vld [vmem:[%s3946_s5 + $0xb8] sm:$0xff]  }
 0x1e2   : > { %2685 = vmatprep.subr.bf16.mxu1 %v2971_v28 }
 0x1e4   : > { %1295 = vmatmul.mubr.bf16.vlgmr.msra.gmra.mrb[8].mxu1 %v945_v16  ;;  %2678 = vmatpush3.bf16.msra.mxu0 %v2988_v18 }
 0x1e5   : > { %1302 = vmatprep.mubr.bf16.mxu1 %v950_v13  ;;  %2686 = vmatpush3.bf16.msra.mxu1 %v2972_v27 }
 0x1e6   : > { %2687 = vmatprep.subr.bf16.mxu1 %v2973_v30  ;;  %2756 = vmatprep.subr.bf16.mxu0 %v3120_v61 }
 0x1e9   : > { %2688 = vmatpush3.bf16.msra.mxu1 %v2975_v23 }
 0x1ea   : > { %2689 = vmatprep.subr.bf16.mxu1 %v2977_v44 }
 0x1ec   : > { %1303 = vmatmul.mubr.bf16.gmra.mrb[12].mxu1 %v949_v5 }
 0x1ed   : > { %2690 = vmatpush3.bf16.msra.mxu1 %v2978_v50 }
 0x1ee   : > { %2691 = vmatprep.subr.bf16.mxu1 %v2979_v1 }
 0x1f1   : > { %2692 = vmatpush3.bf16.msra.mxu1 %v2981_v14 }
 0x1f2   : > { %2693 = vmatprep.subr.bf16.mxu1 %v2983_v21  ;;  %v2993_v21 = vld [vmem:[%s3946_s5 + $0x100] sm:$0xff]  }
 0x1f5   : > { %2694 = vmatpush3.bf16.msra.mxu1 %v2984_v59 }
 0x1f6   : > { %2695 = vmatprep.subr.bf16.mxu1 %v2985_v8 }
 0x1f9   : > { %2696 = vmatpush3.bf16.msra.mxu1 %v2987_v4  ;;  %v2995_v4 = vld [vmem:[%s3946_s5 + $0x110] sm:$0xff]  }
 0x1fa   : > { %2697 = vmatprep.subr.bf16.mxu1 %v2989_v57  ;;  %v3020_v57 = vld [vmem:[%s3948_s7 + $0x6c] ss:$16 sps:$4 sm:$0xff]  }
 0x1fd   : > { %2698 = vmatpush3.bf16.msra.mxu1 %v2990_v20  ;;  %v3018_v20 = vld [vmem:[%s3948_s7 + $0x68] ss:$16 sps:$4 sm:$0xff]  }
 0x1fe   : > { %2699 = vmatprep.subr.bf16.mxu1 %v2991_v56 }
 0x201   : > { %2700 = vmatpush3.bf16.msra.mxu1 %v2992_v24 }
 0x297   : > { %v2623_v62 = vpop.f32.mrb[0].mxu1 }
 0x298   : > { %v2624_v31 = vpop.f32.mrb[1].mxu1 }
 0x299   : > { %v2625_v32 = vadd.f32 %v2624_v31, %v2623_v62  ;;  %v2626_v15 = vpop.f32.mrb[2].mxu1  ;;  %v2997_v62 = vld [vmem:[%s3948_s7] ss:$16 sps:$4 sm:$0xff]   ;;  %v2999_v31 = vld [vmem:[%s3948_s7 + $0x4] ss:$16 sps:$4 sm:$0xff]  }
 0x29a   : > { %v2627_v34 = vpop.f32.mrb[3].mxu1  ;;  %1885 = vmatprep.subr.bf16.mxu1 %v2999_v31  ;;  %v3049_v31 = vld [vmem:[%s3950_s9 + $0x78] sm:$0xff]  }
 0x29b   : > { %v2628_v35 = vadd.f32 %v2627_v34, %v2626_v15  ;;  %v1249_v48 = vadd.f32 %v2625_v32, %v2416_v46  ;;  %v3000_v32 = vld [vmem:[%s3948_s7 + $0x8] ss:$16 sps:$4 sm:$0xff]   ;;  %v3002_v15 = vld [vmem:[%s3948_s7 + $0xc] ss:$16 sps:$4 sm:$0xff]   ;;  %v3005_v34 = vld [vmem:[%s3948_s7 + $0x24] ss:$16 sps:$4 sm:$0xff]  }
 0x29d   : > { %v1252_v60 = vadd.f32 %v2628_v35, %v2416_v46  ;;  %v3008_v35 = vld [vmem:[%s3948_s7 + $0x2c] ss:$16 sps:$4 sm:$0xff]  }
 0x29f   : > { %v2629_v37 = vpop.f32.mrb[4].mxu1 }
 0x2a0   : > { %v2630_v38 = vpop.f32.mrb[5].mxu1 }
 0x2a1   : > { %v2631_v40 = vadd.f32 %v2630_v38, %v2629_v37  ;;  %v2632_v43 = vpop.f32.mrb[6].mxu1  ;;  %v3003_v37 = vld [vmem:[%s3948_s7 + $0x20] ss:$16 sps:$4 sm:$0xff]   ;;  %v3006_v38 = vld [vmem:[%s3948_s7 + $0x28] ss:$16 sps:$4 sm:$0xff]  }
 0x2a2   : > { %v2633_v47 = vpop.f32.mrb[7].mxu1  ;;  %v3014_v43 = vld [vmem:[%s3948_s7 + $0x4c] ss:$16 sps:$4 sm:$0xff]  }
 0x2a3   : > { %v1257_v39 = vadd.f32 %v2631_v40, %v2416_v46  ;;  %v3011_v40 = vld [vmem:[%s3948_s7 + $0x44] ss:$16 sps:$4 sm:$0xff]   ;;  %v3009_v46 = vld [vmem:[%s3948_s7 + $0x40] ss:$16 sps:$4 sm:$0xff]   ;;  %v3012_v47 = vld [vmem:[%s3948_s7 + $0x48] ss:$16 sps:$4 sm:$0xff]  }
 0x2b7   : > { %v2651_v16 = vpop.f32.mrb[8].mxu1 }
 0x2b8   : > { %v2652_v0 = vpop.f32.mrb[9].mxu1 }
 0x2b9   : > { %v2653_v53 = vadd.f32 %v2652_v0, %v2651_v16  ;;  %v2654_v54 = vpop.f32.mrb[10].mxu1  ;;  %v3015_v16 = vld [vmem:[%s3948_s7 + $0x60] ss:$16 sps:$4 sm:$0xff]   ;;  %v3122_v0 = vmov 0  }
 0x2ba   : > { %v2655_v55 = vpop.f32.mrb[11].mxu1 }
 0x2bb   : > { %v1297_v33 = vadd.f32 %v2653_v53, %v1249_v48  ;;  %v2656_v6 = vadd.f32 %v2655_v55, %v2654_v54  ;;  %v3021_v48 = vld [vmem:[%s3950_s9 + $0x40] sm:$0xff]  }
 0x2bc   : > { %v3022_v53 = vld [vmem:[%s3950_s9 + $0xc0] sm:$0xff]  }
 0x2bd   : > { %v1310_v12 = vmax.f32 %v1297_v33, 0.0  ;;  %v1300_v41 = vadd.f32 %v2656_v6, %v1252_v60  ;;  %v2449_v55 = vld [vmem:[%s3947_s6] ss:$0 sm:$0xff] }
 0x2bf   : > { %v1311_v22 = vmax.f32 %v1300_v41, 0.0  ;;  %v2657_v9 = vpop.f32.mrb[12].mxu1  ;;  %v1314_v13 = vrot.slane %v1310_v12, 2  ;;  %v1320_v49 = vrot.slane %v1310_v12, 6  ;;  %v1318_v42 = vrot.slane %v1310_v12, 4 }
 0x2c0   : > { %v2658_v17 = vpop.f32.mrb[13].mxu1 }
 0x2c1   : > { %v2659_v63 = vadd.f32 %v2658_v17, %v2657_v9  ;;  %v2660_v5 = vpop.f32.mrb[14].mxu1  ;;  %v2903_v11 = vpack.i.bf16 %v1314_v13, %v1320_v49  ;;  %v1325_v25 = vrot.slane %v1311_v22, 2  ;;  %v1331_v7 = vrot.slane %v1311_v22, 6 }
 0x2c2   : > { %v2661_v26 = vpop.f32.mrb[15].mxu1  ;;  %v1329_v45 = vrot.slane %v1311_v22, 4 }
 0x2c3   : > { %v1305_v28 = vadd.f32 %v2659_v63, %v1257_v39  ;;  %2904 = vrot.lane.b32.xlu0 %v2903_v11, %s3117_s30  ;;  %v2908_v27 = vpack.i.bf16 %v1325_v25, %v1331_v7  ;;  %v3017_v39 = vld [vmem:[%s3948_s7 + $0x64] ss:$16 sps:$4 sm:$0xff]  }
 0x2c4   : > { %v3023_v7 = vld [vmem:[%s3950_s9] sm:$0xff]  }
 0x2c5   : > { %2909 = vrot.lane.b32.xlu1 %v2908_v27, %s3117_s30  ;;  %v1312_v52 = vmax.f32 %v1305_v28, 0.0  ;;  %v3024_v26 = vld [vmem:[%s3950_s9 + $0x80] sm:$0xff]   ;;  %v3025_v27 = vld [vmem:[%s3950_s9 + $0x48] sm:$0xff]   ;;  %s3059_s30 = scalar_lea.vmem %s3058_s15, 64 }
 0x2c6   : > { %p3061_p1 = scmp.lt.s32.totalorder %s3059_s30, %s3053_s19 }
 0x2c7   : > { %v1343_v18 = vpack.c.bf16 %v1312_v52, %v1312_v52  ;;  %v3046_v52 = vld [vmem:[%s3950_s9 + $0xf0] sm:$0xff]  }
 0x2c8   : > { %p3062_p2 = por %p3061_p1, %p3060_p0 }
 0x2ca   : > { %p3063_p3 = pnand %p3062_p2, %p3056_p13 }
 0x335   : > { %v2905_v29 = vpop.permute.xlu0 %2904 }
 0x336   : > { %v2907_v30 = vunpack.i.h.bf16 %v2905_v29  ;;  %v2906_v23 = vunpack.i.l.bf16 %v2905_v29  ;;  %v3026_v29 = vld [vmem:[%s3950_s9 + $0xc8] sm:$0xff]  }
 0x337   : > { %v2910_v44 = vpop.permute.xlu1 %2909 }
 0x338   : > { %v1335_v50 = vsel %vm908_vm3, %v1310_v12, %v2907_v30  ;;  %v2912_v51 = vunpack.i.h.bf16 %v2910_v44  ;;  %v2911_v1 = vunpack.i.l.bf16 %v2910_v44  ;;  %v1336_v36 = vsel %vm908_vm3, %v1318_v42, %v2906_v23  ;;  %v3027_v30 = vld [vmem:[%s3950_s9 + $0x8] sm:$0xff]   ;;  %v3029_v42 = vld [vmem:[%s3950_s9 + $0x50] sm:$0xff]  }
 0x339   : > { %v1339_v14 = vpack.c.bf16 %v1335_v50, %v1335_v50  ;;  %v1340_v19 = vpack.c.bf16 %v1336_v36, %v1336_v36  ;;  %v3028_v23 = vld [vmem:[%s3950_s9 + $0x88] sm:$0xff]   ;;  %v3030_v44 = vld [vmem:[%s3950_s9 + $0xd0] sm:$0xff]   ;;  %v3035_v36 = vld [vmem:[%s3950_s9 + $0x18] sm:$0xff]  }
 0x33a   : > { %v1337_v58 = vsel %vm908_vm3, %v1311_v22, %v2912_v51  ;;  %v1338_v59 = vsel %vm908_vm3, %v1329_v45, %v2911_v1  ;;  %v3031_v45 = vld [vmem:[%s3950_s9 + $0x10] sm:$0xff]   ;;  %v3033_v51 = vld [vmem:[%s3950_s9 + $0x58] sm:$0xff]  }
 0x33b   : > { %v1341_v2 = vpack.c.bf16 %v1337_v58, %v1337_v58  ;;  %1674 = vmatprep.mubr.bf16.mxu0 %v1340_v19  ;;  %v1342_v8 = vpack.c.bf16 %v1338_v59, %v1338_v59  ;;  %v3032_v50 = vld [vmem:[%s3950_s9 + $0x90] sm:$0xff]   ;;  %v3034_v1 = vld [vmem:[%s3950_s9 + $0xd8] sm:$0xff]   ;;  %v3037_v19 = vld [vmem:[%s3950_s9 + $0x60] sm:$0xff]  }
 0x33c   : > { %1675 = vmatmul.mubr.bf16.vlgmr.msra.gmra.mrb[32].mxu0 %v1339_v14  ;;  %v3036_v14 = vld [vmem:[%s3950_s9 + $0x98] sm:$0xff]   ;;  %v3039_v58 = vld [vmem:[%s3950_s9 + $0x20] sm:$0xff]  }
 0x33d   : > { %2757 = vmatpush3.bf16.msra.mxu0 %v2993_v21  ;;  %1714 = vmatprep.mubr.bf16.mxu1 %v1342_v8  ;;  %v3038_v21 = vld [vmem:[%s3950_s9 + $0xe0] sm:$0xff]   ;;  %v3042_v8 = vld [vmem:[%s3950_s9 + $0xe8] sm:$0xff]  }
 0x33e   : > { %1715 = vmatmul.mubr.bf16.vlgmr.msra.gmra.mrb[16].mxu1 %v1341_v2  ;;  %2758 = vmatprep.subr.bf16.mxu0 %v3120_v61  ;;  %v3040_v59 = vld [vmem:[%s3950_s9 + $0xa0] sm:$0xff]   ;;  %v3041_v2 = vld [vmem:[%s3950_s9 + $0x68] sm:$0xff]  }
 0x33f   : > { %2764 = vmatprep.mubr.msk.bf16.mxu0 %vm3121_vm5, %v3120_v61  ;;  %1886 = vmatpush1.bf16.msra.mxu1 %v2997_v62  ;;  %v3048_v62 = vld [vmem:[%s3950_s9 + $0xb0] sm:$0xff]  }
 0x340   : > { %1887 = vmatprep.subr.bf16.mxu1 %v3005_v34  ;;  %1917 = vmatprep.mubr.bf16.mxu1 %v3122_v0  ;;  %v3052_v34 = vld [vmem:[%s3950_s9 + $0xb8] sm:$0xff]  }
 0x341   : > { %2759 = vmatpush3.bf16.msra.mxu0 %v2994_v3  ;;  %v3043_v3 = vld [vmem:[%s3950_s9 + $0x28] sm:$0xff]  }
 0x342   : > { %2760 = vmatprep.subr.bf16.mxu0 %v3120_v61 }
 0x343   : > { %1888 = vmatpush1.bf16.msra.mxu1 %v3003_v37 }
 0x344   : > { %1889 = vmatprep.subr.bf16.mxu1 %v3011_v40 }
 0x345   : > { %2761 = vmatpush3.bf16.msra.mxu0 %v2995_v4  ;;  %v3044_v4 = vld [vmem:[%s3950_s9 + $0xa8] sm:$0xff]  }
 0x346   : > { %2762 = vmatprep.subr.bf16.mxu0 %v3120_v61 }
 0x347   : > { %1890 = vmatpush1.bf16.msra.mxu1 %v3009_v46 }
 0x348   : > { %1891 = vmatprep.subr.bf16.mxu1 %v3017_v39 }
 0x349   : > { %2763 = vmatpush3.bf16.msra.mxu0 %v2996_v10  ;;  %v3045_v10 = vld [vmem:[%s3950_s9 + $0x70] sm:$0xff]  }
 0x34a   : > { %1926 = vmatprep.subr.bf16.mxu0 %v3002_v15  ;;  %v3051_v15 = vld [vmem:[%s3950_s9 + $0x38] sm:$0xff]  }
 0x34b   : > { %1892 = vmatpush1.bf16.msra.mxu1 %v3015_v16 }
 0x34c   : > { %2765 = vmatmul.mubr.msk.bf16.vlgmr.msra.gmra.mrb[36].mxu0 %vm908_vm3, %v1343_v18  ;;  %2712 = vmatprep.subr.bf16.mxu1 %v3021_v48  ;;  %v3047_v18 = vld [vmem:[%s3950_s9 + $0x30] sm:$0xff]  }
 0x34d   : > { %1927 = vmatpush1.bf16.msra.mxu0 %v3000_v32  ;;  %1958 = vmatprep.mubr.bf16.mxu0 %v3122_v0  ;;  %v3050_v32 = vld [vmem:[%s3950_s9 + $0xf8] sm:$0xff]  }
 0x34e   : > { %1928 = vmatprep.subr.bf16.mxu0 %v3008_v35  ;;  %v1782_v35 = vlaneseq }
 0x350   : > { %v1783_v37 = vshrl.u32 %v1782_v35, 7 }
 0x351   : > { %1929 = vmatpush1.bf16.msra.mxu0 %v3006_v38 }
 0x352   : > { %1930 = vmatprep.subr.bf16.mxu0 %v3014_v43  ;;  %v1784_v38 = vsub.s32 0, %v1783_v37  ;;  %v1792_v40 = vsub.s32 2, %v1783_v37  ;;  %v1780_v43 = vld [vmem:[%s3949_s8] sm:$0xf]  ;;  %v1788_v46 = vsub.s32 1, %v1783_v37 }
 0x354   : > { %v1785_v39 = vrot.slane %v1780_v43, %v1784_v38  ;;  %v1789_v16 = vrot.slane %v1780_v43, %v1788_v46 }
 0x355   : > { %1931 = vmatpush1.bf16.msra.mxu0 %v3012_v47  ;;  %v1796_v47 = vsub.s32 3, %v1783_v37 }
 0x356   : > { %1932 = vmatprep.subr.bf16.mxu0 %v3020_v57  ;;  %v1793_v57 = vrot.slane %v1780_v43, %v1792_v40 }
 0x359   : > { %1933 = vmatpush1.bf16.msra.mxu0 %v3018_v20  ;;  %v1797_v20 = vrot.slane %v1780_v43, %v1796_v47 }
 0x35a   : > { %2734 = vmatprep.subr.bf16.mxu0 %v3022_v53 }
 0x40f   : > { %v2679_v54 = vpop.f32.mrb[32].mxu0 }
 0x410   : > { %v2680_v56 = vpop.f32.mrb[33].mxu0 }
 0x411   : > { %v2681_v60 = vadd.f32 %v2680_v56, %v2679_v54  ;;  %v2682_v33 = vpop.f32.mrb[34].mxu0  ;;  %v2701_v6 = vpop.f32.mrb[16].mxu1 }
 0x412   : > { %v2683_v24 = vpop.f32.mrb[35].mxu0  ;;  %v2702_v61 = vpop.f32.mrb[17].mxu1 }
 0x413   : > { %v1677_v12 = vadd.f32 %v2681_v60, %v2449_v55  ;;  %v2703_v41 = vadd.f32 %v2702_v61, %v2701_v6  ;;  %v2704_v22 = vpop.f32.mrb[18].mxu1 }
 0x414   : > { %v2705_v9 = vpop.f32.mrb[19].mxu1 }
 0x415   : > { %v1717_v13 = vadd.f32 %v2703_v41, %v1677_v12 }
 0x41f   : > { %v1756_v49 = vpop.f32.mrb[36].mxu0 }
 0x420   : > { %v1757_v17 = vadd.f32 %v1756_v49, %v1717_v13  ;;  %v2766_v63 = vpop.f32.mrb[37].mxu0 }
 0x421   : > { %v1759_v5 = vpop.f32.mrb[38].mxu0 }
 0x422   : > { %v1762_v11 = vmax.f32 %v1757_v17, 0.0  ;;  %v2767_v25 = vpop.f32.mrb[39].mxu0 }
 0x424   : > { %v1763_v28 = vpack.c.bf16 %v1762_v11, %v1762_v11 }
 0x426   : > { %2503 = vmatmul.mubr.msk.bf16.vlgmr.msra.gmra.mrb[20].mxu1 %vm908_vm3, %v1763_v28  ;;  %2504 = vmatmul.mubr.msk.bf16.vlgmr.msra.gmra.mrb[40].mxu0 %vm908_vm3, %v1763_v28 }
 0x427   : > { %2713 = vmatpush3.bf16.msra.mxu1 %v3023_v7  ;;  %2735 = vmatpush3.bf16.msra.mxu0 %v3024_v26  ;;  %v2505_v7 = vld [vmem:[%s3951_s10] ss:$0 sm:$0xff] }
 0x428   : > { %2714 = vmatprep.subr.bf16.mxu1 %v3025_v27  ;;  %2736 = vmatprep.subr.bf16.mxu0 %v3026_v29 }
 0x42b   : > { %2715 = vmatpush3.bf16.msra.mxu1 %v3027_v30  ;;  %2737 = vmatpush3.bf16.msra.mxu0 %v3028_v23 }
 0x42c   : > { %2716 = vmatprep.subr.bf16.mxu1 %v3029_v42  ;;  %2738 = vmatprep.subr.bf16.mxu0 %v3030_v44 }
 0x42f   : > { %2717 = vmatpush3.bf16.msra.mxu1 %v3031_v45  ;;  %2739 = vmatpush3.bf16.msra.mxu0 %v3032_v50 }
 0x430   : > { %2718 = vmatprep.subr.bf16.mxu1 %v3033_v51  ;;  %2740 = vmatprep.subr.bf16.mxu0 %v3034_v1 }
 0x433   : > { %2719 = vmatpush3.bf16.msra.mxu1 %v3035_v36  ;;  %2741 = vmatpush3.bf16.msra.mxu0 %v3036_v14 }
 0x434   : > { %2720 = vmatprep.subr.bf16.mxu1 %v3037_v19  ;;  %2742 = vmatprep.subr.bf16.mxu0 %v3038_v21 }
 0x437   : > { %2721 = vmatpush3.bf16.msra.mxu1 %v3039_v58  ;;  %2743 = vmatpush3.bf16.msra.mxu0 %v3040_v59 }
 0x438   : > { %2722 = vmatprep.subr.bf16.mxu1 %v3041_v2  ;;  %2744 = vmatprep.subr.bf16.mxu0 %v3042_v8 }
 0x43b   : > { %2723 = vmatpush3.bf16.msra.mxu1 %v3043_v3  ;;  %2745 = vmatpush3.bf16.msra.mxu0 %v3044_v4 }
 0x43c   : > { %2724 = vmatprep.subr.bf16.mxu1 %v3045_v10  ;;  %2746 = vmatprep.subr.bf16.mxu0 %v3046_v52 }
 0x43f   : > { %2725 = vmatpush3.bf16.msra.mxu1 %v3047_v18  ;;  %2747 = vmatpush3.bf16.msra.mxu0 %v3048_v62 }
 0x440   : > { %2726 = vmatprep.subr.bf16.mxu1 %v3049_v31  ;;  %2748 = vmatprep.subr.bf16.mxu0 %v3050_v32 }
 0x443   : > { %2727 = vmatpush3.bf16.msra.mxu1 %v3051_v15  ;;  %2749 = vmatpush3.bf16.msra.mxu0 %v3052_v34 }
 0x4f9   : > { %v1919_v0 = vpop.f32.mrb[20].mxu1  ;;  %v1960_v48 = vpop.f32.mrb[40].mxu0 }
 0x4fa   : > { %v1920_v53 = vadd.f32 %v1919_v0, %v1785_v39  ;;  %v1961_v54 = vadd.f32 %v1960_v48, %v1793_v57  ;;  %v1921_v55 = vpop.f32.mrb[21].mxu1  ;;  %v1962_v56 = vpop.f32.mrb[41].mxu0 }
 0x4fb   : > { %v1922_v60 = vadd.f32 %v1921_v55, %v1789_v16  ;;  %v1963_v33 = vadd.f32 %v1962_v56, %v1797_v20  ;;  %v1923_v6 = vpop.f32.mrb[22].mxu1  ;;  %v1964_v24 = vpop.f32.mrb[42].mxu0 }
 0x4fc   : > { %v1967_v61 = vmax.f32 %v1920_v53, 0.0  ;;  %v1969_v12 = vmax.f32 %v1961_v54, 0.0  ;;  %v1924_v41 = vpop.f32.mrb[23].mxu1  ;;  %v1965_v22 = vpop.f32.mrb[43].mxu0 }
 0x4fd   : > { %v1968_v9 = vmax.f32 %v1922_v60, 0.0  ;;  %v1970_v13 = vmax.f32 %v1963_v33, 0.0 }
 0x4fe   : > { %v1971_v63 = vpack.c.bf16 %v1967_v61, %v1967_v61  ;;  %v1973_v5 = vpack.c.bf16 %v1969_v12, %v1969_v12 }
 0x4ff   : > { %v1972_v49 = vpack.c.bf16 %v1968_v9, %v1968_v9  ;;  %v1974_v17 = vpack.c.bf16 %v1970_v13, %v1970_v13 }
 0x501   : > { %2270 = vmatprep.mubr.bf16.mxu1 %v1972_v49  ;;  %2310 = vmatprep.mubr.bf16.mxu0 %v1974_v17 }
 0x502   : > { %2271 = vmatmul.mubr.bf16.vlgmr.msra.gmra.mrb[24].mxu1 %v1971_v63  ;;  %2311 = vmatmul.mubr.bf16.vlgmr.msra.gmra.mrb[44].mxu0 %v1973_v5 }
 0x5d5   : > { %v2728_v11 = vpop.f32.mrb[24].mxu1  ;;  %v2750_v25 = vpop.f32.mrb[44].mxu0 }
 0x5d6   : > { %v2729_v26 = vpop.f32.mrb[25].mxu1  ;;  %v2751_v28 = vpop.f32.mrb[45].mxu0 }
 0x5d7   : > { %v2730_v27 = vadd.f32 %v2729_v26, %v2728_v11  ;;  %v2752_v29 = vadd.f32 %v2751_v28, %v2750_v25  ;;  %v2731_v30 = vpop.f32.mrb[26].mxu1  ;;  %v2753_v23 = vpop.f32.mrb[46].mxu0 }
 0x5d8   : > { %v2732_v42 = vpop.f32.mrb[27].mxu1  ;;  %v2754_v44 = vpop.f32.mrb[47].mxu0 }
 0x5d9   : > { %v2273_v45 = vadd.f32 %v2730_v27, %v2505_v7 }
 0x5db   : > { %v2313_v50 = vadd.f32 %v2752_v29, %v2273_v45 }
 0x5dd   : > { %2318 = vst [vmem:[%s379_s25] sm:$0x3] %v2313_v50 }
 0x5de   : > { %3066 = shalt.err (!%p3063_p3)
}
 0x5df   : > { %s3067_s26 = scalar_lea.hbm %s3899_s16, 32  ;;  %s3071_s25 = scalar_lea.hbm %s3952_s11, 64 }
 0x5e0   : > { %p3068_p4 = scmp.ne.s32.totalorder %s3899_s16, %s3067_s26  ;;  %p3072_p9 = scmp.lt.u32.totalorder %s3899_s16, %s3952_s11 }
 0x5e1   : > { %p3073_p10 = scmp.lt.u32.totalorder %s3071_s25, %s3067_s26  ;;  %p3075_p12 = scmp.lt.u32.totalorder %s3067_s26, %s3899_s16 }
 0x5e2   : > { %p3069_p7 = pnand %p3068_p4, %p3222_p5 }
 0x5e3   : > { %p3074_p11 = por %p3073_p10, %p3072_p9 }
 0x5e4   : > { %p3070_p8 = pneg %p3069_p7 }
 0x5e5   : > { %p3076_p13 = por %p3075_p12, %p3074_p11 }
 0x5e7   : > { %p3077_p0 = pnand %p3076_p13, %p3070_p8 }
 0x5e9   : > { %3080 = shalt.err (!%p3077_p0)
}
 0x5ea   : > { %2768 = dma.vmem_to_hbm [thread:$0]  (%p3222_p5), %s3901_s12, 32, %s3899_s16, %s2320_s22  }
 0x5eb PF: > { %p2774_p1 = scmp.ge.s32.totalorder %s3115_s20, 2  ;;  %s2345_s19 = sand.u32 1, %s3103_s17  }
 0x5ec   : > { %s2346_s21 = scalar_lea.sflag [#allocation3], %s2345_s19 }
 0x5ed   : > { %p2771_p2 = pnand %p2774_p1, %p3226_p6 }
 0x5ef   : > { %3098 = dma.done.wait (!%p2771_p2), %s2346_s21, 32  }
 0x5f0   : > { %3100 = vsyncadd (!%p2771_p2), %s2346_s21, 4294967264  ;;  %s3958_s15 = sld [smem:[#allocation5_spill]]  ;;  %s3959_s19 = sld [smem:[#allocation6_spill]] }
 0x5f1   : > { %p21_p3 = scmp.ge.s32.totalorder %s3209_s23, 4   ;;  %s3960_s17 = smov %s3107_s18 }
 0x5f2   : > { %s3962_s20 = smov %s3209_s23 }
 0x5f3   :  { %23 = sbr.rel (!%p21_p3) target bundleno = 3 (0x3), region = 99 }
 0x5f6   : > { %s3961_s18 = smov %s3958_s15 }
 0x5fa   :  { %2351 = vsyncpa [#allocation3], 1 }
 0x5fb   :  { %2353 = vsyncpa [#allocation3 + $0x1], 1 }

</bundles_post_ra>
